<compile_context>
chip_gen: v7x
topology: tpu7x:2x2x1
jax: 0.10.0
libtpu: 0.0.40
codegen_flags: <defaults>
</compile_context>

<pallas_src>
import jax
import jax.numpy as jnp
from jax.experimental import pallas as pl
from jax.experimental.pallas import tpu as pltpu

NDF = 64
BN_EPS = 1e-5
LEAK = 0.2


def _leaky(x):
    return jnp.where(x >= 0, x, LEAK * x)


# ---------------------------------------------------------------------------
# JAX-side glue: conv1 im2col (Cin=1, tiny) + parity/offset re-ordering so that
# conv2 becomes one deep-K in-kernel matmul over the VMEM-resident h1.
# ---------------------------------------------------------------------------
def _im2col_4d(x_nhwc, k, s, p):
    """(B, OH, OW, C*k*k); patch flattening order (C, kh, kw) matches
    PyTorch weight.reshape(Cout, -1)."""
    B, H, W, C = x_nhwc.shape
    xp = jnp.pad(x_nhwc, ((0, 0), (p, p), (p, p), (0, 0)))
    OH = (H + 2 * p - k) // s + 1
    OW = (W + 2 * p - k) // s + 1
    cols = jnp.stack(
        [xp[:, i:i + s * OH:s, j:j + s * OW:s, :]
         for i in range(k) for j in range(k)],
        axis=-1,
    )  # (B, OH, OW, C, k*k); last-axis index = kh*k + kw
    return cols.reshape(B, OH, OW, C * k * k)


# Row-parity / per-kw column (dst, src) maps.  Conv2 tap (kh, kw) reads padded h1
# position ih = 2*oh + kh - 1, iw = 2*ow + kw - 1.  Splitting h1 into even/odd
# row & column planes (conv padding realized as zero grid slots) makes every tap
# a contiguous window of one plane.
_ROW_MAPS = {0: (slice(0, 7), slice(0, 14, 2)),    # even h1 rows 0,2,...,12
             1: (slice(1, 8), slice(1, 14, 2))}    # odd  h1 rows 1,3,...,13
_COL_MAPS_KW = {0: (slice(1, 8), slice(1, 14, 2)),
                1: (slice(0, 7), slice(0, 14, 2)),
                2: (slice(0, 7), slice(1, 14, 2)),
                3: (slice(0, 6), slice(2, 14, 2))}


def _grid_block(cols1, rmap, cmap):
    """Place a strided (row, col) slice of the 14x14 conv1 patch grid into an
    8x8 zero-padded grid via jnp.pad (no scatter)."""
    rdst, rsrc = rmap
    cdst, csrc = cmap
    src = cols1[:, rsrc, csrc, :]
    return jnp.pad(src, ((0, 0),
                         (rdst.start, 8 - rdst.stop),
                         (cdst.start, 8 - cdst.stop),
                         (0, 0)))


def _build_conv1_cols(cols1):
    """Build 4 row-parity super-blocks; each row pairs the patches of two
    adjacent-kw column planes (K=32) so the paired conv1 GEMM emits 128-lane
    tap pairs.  Result: (4*(B*64 + 8), 32); 8 trailing rows per super-block are
    padding so the ro=1 tap slices stay in bounds."""
    B = cols1.shape[0]
    K = cols1.shape[-1]
    sbs = []
    for rp in (0, 1):                   # super-block row parity
        for half in (0, 1):             # kw pair {0,1} or {2,3}
            a = _grid_block(cols1, _ROW_MAPS[rp], _COL_MAPS_KW[2 * half])
            b = _grid_block(cols1, _ROW_MAPS[rp], _COL_MAPS_KW[2 * half + 1])
            sbs.append(jnp.concatenate([a, b], axis=-1))     # (B, 8, 8, 2K)
    cols = jnp.stack(sbs, axis=0).reshape(4, B * 64, 2 * K)
    cols = jnp.pad(cols, ((0, 0), (0, 8), (0, 0)))
    return cols.reshape(4 * (B * 64 + 8), 2 * K)


# ---------------------------------------------------------------------------
# Fused kernel: conv1 paired GEMM + LeakyReLU -> conv2 (single K=1024 matmul)
# -> BatchNorm (batch stats) + LeakyReLU -> Linear + Sigmoid.
# ---------------------------------------------------------------------------
def _make_kernel(batch):
    b64 = batch * 64
    blk_rows = b64 + 8
    c2 = 2 * NDF
    inv_n = 1.0 / float(batch * 49)

    def kernel(cols_ref, w1_ref, w2_ref, g_ref, bt_ref, wn_ref, bfc_ref,
               valid_ref, o_ref):
        # ---- Conv1 as one paired GEMM (bf16 operands, f32 accum) + LeakyReLU.
        # h1 stays in VMEM; lanes [0:64]/[64:128] are the two paired kw planes.
        h1 = _leaky(jnp.dot(cols_ref[...], w1_ref[...],
                            preferred_element_type=jnp.float32))  # (4*blk, 128) f32

        # ---- Conv2 as ONE deep-K matmul: gather 8 vreg-aligned 128-lane tap-pair
        # slices (static, 8-sublane / 128-lane aligned), concat along lanes
        # -> (B*64, 1024), single K=1024 MXU pass with f32 accumulation.
        pieces = []
        for kh in range(4):
            rp, ro = (kh + 1) % 2, kh // 2
            for half in range(2):                     # kw in {0,1} then {2,3}
                sb = rp * 2 + half
                start = sb * blk_rows + ro * 8        # 8-aligned static offset
                pieces.append(h1[start:start + b64, :])
        h1cat = jnp.concatenate(pieces, axis=1).astype(jnp.bfloat16)  # (B*64, 1024)
        h2 = jnp.dot(h1cat, w2_ref[...],
                     preferred_element_type=jnp.float32)              # (B*64, 128)

        # ---- BatchNorm2d (training batch stats over valid 7x7 grid), single
        # pass: masked sum & sum-of-squares, var = E[x^2] - mean^2.
        valid = valid_ref[...]                        # (B*64, 1) f32, 0/1
        h2m = h2 * valid
        mean = jnp.sum(h2m, axis=0, keepdims=True) * inv_n            # (1, 128)
        ex2 = jnp.sum(h2m * h2, axis=0, keepdims=True) * inv_n
        var = ex2 - mean * mean
        y = (h2 - mean) * jax.lax.rsqrt(var + BN_EPS) * g_ref[...] + bt_ref[...]
        y = _leaky(y)                                                 # (B*64, 128) f32

        # ---- Linear(6272, 1) + Sigmoid: batched VPU multiply/reduce, one store.
        y3 = y.reshape(batch, 64, c2)                 # sublane split (64 % 8 == 0)
        s = jnp.sum(y3 * wn_ref[...], axis=2, keepdims=True)   # (B, 64, 1)
        s = jnp.sum(s, axis=1, keepdims=True)                   # (B, 1, 1)
        o_ref[...] = jax.nn.sigmoid(s.reshape(batch, 1) + bfc_ref[...])

    return kernel


# ---------------------------------------------------------------------------
# Forward pass (matches Discriminator.forward semantics, training-mode BN)
# ---------------------------------------------------------------------------
def discriminator_forward(x_nchw, params):
    B = x_nchw.shape[0]
    b64 = B * 64
    x = jnp.transpose(x_nchw, (0, 2, 3, 1)).astype(jnp.float32)   # NCHW -> NHWC

    cols1 = _im2col_4d(x, 4, 2, 1)                   # (B, 14, 14, 16)
    cols = _build_conv1_cols(cols1).astype(jnp.bfloat16)          # (4*(B*64+8), 32)

    # Block-diagonal paired conv1 weight (32, 128): [[w1, 0], [0, w1]].
    w1m = params["w1"].reshape(NDF, 16).T.astype(jnp.float32)     # (16, 64)
    w1w = jnp.zeros((32, 2 * NDF), jnp.float32)
    w1w = w1w.at[:16, :NDF].set(w1m).at[16:, NDF:].set(w1m)
    w1w = w1w.astype(jnp.bfloat16)

    # Conv2 weight flattened for the deep-K matmul: row = (kh*4+kw)*64 + cin.
    w2flat = jnp.transpose(params["w2"], (2, 3, 1, 0)).reshape(16 * NDF, 2 * NDF)
    w2flat = w2flat.astype(jnp.bfloat16)

    gamma = params["gamma"].reshape(1, 2 * NDF).astype(jnp.float32)
    beta = params["beta"].reshape(1, 2 * NDF).astype(jnp.float32)

    # FC weight permuted once into the kernel's natural (r*8+c, C) layout; the
    # PyTorch flatten order is (C, H, W).  Invalid (r=7 or c=7) rows are zero.
    fcw = params["fc_w"].reshape(2 * NDF, 7, 7)
    wn = jnp.pad(jnp.transpose(fcw, (1, 2, 0)), ((0, 1), (0, 1), (0, 0)))
    wn = wn.reshape(64, 2 * NDF).astype(jnp.float32)
    bfc = params["fc_b"].reshape(1, 1).astype(jnp.float32)

    # Validity mask for the BN batch statistics (hoisted out of the kernel).
    idx = jnp.arange(b64, dtype=jnp.int32)
    valid = (((idx % 64) // 8 < 7) & ((idx % 8) < 7)).astype(jnp.float32)
    valid = valid.reshape(b64, 1)

    args = (cols, w1w, w2flat, gamma, beta, wn, bfc, valid)

    flops = (2 * cols.shape[0] * 32 * 2 * NDF          # conv1 paired GEMM
             + 2 * b64 * (16 * NDF) * 2 * NDF          # conv2 deep-K matmul
             + 20 * b64 * 2 * NDF)                     # BN / LeakyReLU / linear
    bytes_accessed = sum(int(a.size) * a.dtype.itemsize for a in args) + B * 4

    out = pl.pallas_call(
        _make_kernel(B),
        out_shape=jax.ShapeDtypeStruct((B, 1), jnp.float32),
        grid=(1,),
        in_specs=[pl.BlockSpec(a.shape, (lambda i, nd=a.ndim: (0,) * nd))
                  for a in args],
        out_specs=pl.BlockSpec((B, 1), lambda i: (0, 0)),
        compiler_params=pltpu.CompilerParams(
            dimension_semantics=("arbitrary",),
            vmem_limit_bytes=32 * 1024 * 1024),
        cost_estimate=pl.CostEstimate(flops=int(flops),
                                      transcendentals=B + 2 * NDF,
                                      bytes_accessed=int(bytes_accessed)),
    )(*args)
    return out                                         # (B, 1)


def init_params(key):
    k1, k2, k3, k4 = jax.random.split(key, 4)
    return {
        # PyTorch layouts: (Cout, Cin, kh, kw) for convs, (out, in) for Linear.
        "w1": 0.02 * jax.random.normal(k1, (NDF, 1, 4, 4), jnp.float32),
        "w2": 0.02 * jax.random.normal(k2, (NDF * 2, NDF, 4, 4), jnp.float32),
        "gamma": jnp.ones((NDF * 2,), jnp.float32),
        "beta": jnp.zeros((NDF * 2,), jnp.float32),
        "fc_w": 0.02 * jax.random.normal(k3, (1, NDF * 2 * 7 * 7), jnp.float32),
        "fc_b": 0.01 * jax.random.normal(k4, (1,), jnp.float32),
    }


# ---------------------------------------------------------------------------
# Pure-JAX reference (XLA, f32 HIGHEST precision) for a correctness check.
# ---------------------------------------------------------------------------
def _reference_forward(x_nchw, params):
    dn = ("NCHW", "OIHW", "NCHW")
    hp = jax.lax.Precision.HIGHEST
    y = jax.lax.conv_general_dilated(
        x_nchw, params["w1"], window_strides=(2, 2), padding=((1, 1), (1, 1)),
        dimension_numbers=dn, precision=hp)
    y = jnp.where(y >= 0, y, LEAK * y)
    y = jax.lax.conv_general_dilated(
        y, params["w2"], window_strides=(2, 2), padding=((1, 1), (1, 1)),
        dimension_numbers=dn, precision=hp)
    mean = jnp.mean(y, axis=(0, 2, 3), keepdims=True)
    var = jnp.mean(jnp.square(y - mean), axis=(0, 2, 3), keepdims=True)
    y = ((y - mean) / jnp.sqrt(var + BN_EPS)
         * params["gamma"].reshape(1, -1, 1, 1)
         + params["beta"].reshape(1, -1, 1, 1))
    y = jnp.where(y >= 0, y, LEAK * y)
    flat = y.reshape(x_nchw.shape[0], -1)
    logits = flat @ params["fc_w"].T + params["fc_b"]
    return jax.nn.sigmoid(logits)


if __name__ == "__main__":
    key = jax.random.PRNGKey(0)
    pkey, xkey = jax.random.split(key)
    params = init_params(pkey)
    # Linear(128*7*7, 1) implies 28x28 single-channel inputs (MNIST-like).
    x = jax.random.normal(xkey, (2, 1, 28, 28), jnp.float32)

    out = jax.block_until_ready(jax.jit(discriminator_forward)(x, params))
    assert out.shape == (2, 1)
    assert bool(jnp.all(jnp.isfinite(out)))
    assert bool(jnp.all((out >= 0.0) & (out <= 1.0)))

    # Tolerance is loosened vs the f32 reference because the MXU operands are
    # bf16 (f32 accumulation via preferred_element_type); layout/mapping errors
    # would still blow way past this bound.
    ref = jax.block_until_ready(jax.jit(_reference_forward)(x, params))
    assert bool(jnp.allclose(out, ref, rtol=1e-2, atol=1e-2)), (out, ref)

    print("KERNEL_OK")
</pallas_src>

<mosaic_0001>
module attributes {stable_mosaic.version = 11 : i64} {
  func.func @kernel(%arg0: i32, %arg1: memref<544x32xbf16, #tpu.memory_space<vmem>>, %arg2: memref<32x128xbf16, #tpu.memory_space<vmem>>, %arg3: memref<1024x128xbf16, #tpu.memory_space<vmem>>, %arg4: memref<1x128xf32, #tpu.memory_space<vmem>>, %arg5: memref<1x128xf32, #tpu.memory_space<vmem>>, %arg6: memref<64x128xf32, #tpu.memory_space<vmem>>, %arg7: memref<1x1xf32, #tpu.memory_space<vmem>>, %arg8: memref<128x1xf32, #tpu.memory_space<vmem>>, %arg9: memref<2x1xf32, #tpu.memory_space<vmem>>) attributes {dimension_semantics = [#tpu.dimension_semantics<arbitrary>], iteration_bounds = array<i64: 1>, scalar_prefetch = 0 : i64, scratch_operands = 0 : i64, tpu.core_type = #tpu.core_type<tc>, window_params = [{pipeline_mode = #tpu.pipeline_mode<synchronous>, transform_indices = @transform_0, window_bounds = array<i64: 544, 32>}, {pipeline_mode = #tpu.pipeline_mode<synchronous>, transform_indices = @transform_1, window_bounds = array<i64: 32, 128>}, {pipeline_mode = #tpu.pipeline_mode<synchronous>, transform_indices = @transform_2, window_bounds = array<i64: 1024, 128>}, {pipeline_mode = #tpu.pipeline_mode<synchronous>, transform_indices = @transform_3, window_bounds = array<i64: 1, 128>}, {pipeline_mode = #tpu.pipeline_mode<synchronous>, transform_indices = @transform_4, window_bounds = array<i64: 1, 128>}, {pipeline_mode = #tpu.pipeline_mode<synchronous>, transform_indices = @transform_5, window_bounds = array<i64: 64, 128>}, {pipeline_mode = #tpu.pipeline_mode<synchronous>, transform_indices = @transform_6, window_bounds = array<i64: 1, 1>}, {pipeline_mode = #tpu.pipeline_mode<synchronous>, transform_indices = @transform_7, window_bounds = array<i64: 128, 1>}, {pipeline_mode = #tpu.pipeline_mode<synchronous>, transform_indices = @transform_8, window_bounds = array<i64: 2, 1>}]} {
    %c0 = arith.constant 0 : index
    %c0_0 = arith.constant 0 : index
    %0 = vector.load %arg1[%c0, %c0_0] : memref<544x32xbf16, #tpu.memory_space<vmem>>, vector<544x32xbf16>
    %c0_1 = arith.constant 0 : index
    %c0_2 = arith.constant 0 : index
    %1 = vector.load %arg2[%c0_1, %c0_2] : memref<32x128xbf16, #tpu.memory_space<vmem>>, vector<32x128xbf16>
    %cst = arith.constant dense<0.000000e+00> : vector<544x128xf32>
    %2 = tpu.matmul %0, %1, %cst {dimension_numbers = #tpu.dot_dimension_numbers<[1], [0], [0], [1], [0, 0, 1, 1], [], []>} : vector<544x32xbf16>, vector<32x128xbf16>, vector<544x128xf32> -> vector<544x128xf32>
    %cst_3 = arith.constant 0.000000e+00 : f32
    %3 = vector.broadcast %cst_3 : f32 to vector<544x128xf32>
    %4 = arith.cmpf oge, %2, %3 : vector<544x128xf32>
    %cst_4 = arith.constant 2.000000e-01 : f32
    %5 = vector.broadcast %cst_4 : f32 to vector<544x128xf32>
    %6 = arith.mulf %5, %2 : vector<544x128xf32>
    %7 = arith.select %4, %2, %6 : vector<544x128xi1>, vector<544x128xf32>
    %8 = vector.extract_strided_slice %7 {offsets = [272, 0], sizes = [128, 128], strides = [1, 1]} : vector<544x128xf32> to vector<128x128xf32>
    %9 = vector.extract_strided_slice %7 {offsets = [408, 0], sizes = [128, 128], strides = [1, 1]} : vector<544x128xf32> to vector<128x128xf32>
    %10 = vector.extract_strided_slice %7 {offsets = [0, 0], sizes = [128, 128], strides = [1, 1]} : vector<544x128xf32> to vector<128x128xf32>
    %11 = vector.extract_strided_slice %7 {offsets = [136, 0], sizes = [128, 128], strides = [1, 1]} : vector<544x128xf32> to vector<128x128xf32>
    %12 = vector.extract_strided_slice %7 {offsets = [280, 0], sizes = [128, 128], strides = [1, 1]} : vector<544x128xf32> to vector<128x128xf32>
    %13 = vector.extract_strided_slice %7 {offsets = [416, 0], sizes = [128, 128], strides = [1, 1]} : vector<544x128xf32> to vector<128x128xf32>
    %14 = vector.extract_strided_slice %7 {offsets = [8, 0], sizes = [128, 128], strides = [1, 1]} : vector<544x128xf32> to vector<128x128xf32>
    %15 = vector.extract_strided_slice %7 {offsets = [144, 0], sizes = [128, 128], strides = [1, 1]} : vector<544x128xf32> to vector<128x128xf32>
    %16 = tpu.concatenate %8, %9, %10, %11, %12, %13, %14, %15 in 1 : vector<128x128xf32>, vector<128x128xf32>, vector<128x128xf32>, vector<128x128xf32>, vector<128x128xf32>, vector<128x128xf32>, vector<128x128xf32>, vector<128x128xf32> -> vector<128x1024xf32>
    %17 = arith.truncf %16 : vector<128x1024xf32> to vector<128x1024xbf16>
    %c0_5 = arith.constant 0 : index
    %c0_6 = arith.constant 0 : index
    %18 = vector.load %arg3[%c0_5, %c0_6] : memref<1024x128xbf16, #tpu.memory_space<vmem>>, vector<1024x128xbf16>
    %cst_7 = arith.constant dense<0.000000e+00> : vector<128x128xf32>
    %19 = tpu.matmul %17, %18, %cst_7 {dimension_numbers = #tpu.dot_dimension_numbers<[1], [0], [0], [1], [0, 0, 1, 1], [], []>} : vector<128x1024xbf16>, vector<1024x128xbf16>, vector<128x128xf32> -> vector<128x128xf32>
    %c0_8 = arith.constant 0 : index
    %c0_9 = arith.constant 0 : index
    %20 = vector.load %arg8[%c0_8, %c0_9] : memref<128x1xf32, #tpu.memory_space<vmem>>, vector<128x1xf32>
    %21 = vector.broadcast %20 : vector<128x1xf32> to vector<128x128xf32>
    %22 = arith.mulf %19, %21 : vector<128x128xf32>
    %cst_10 = arith.constant dense<0.000000e+00> : vector<128xf32>
    %23 = vector.multi_reduction <add>, %22, %cst_10 [0] : vector<128x128xf32> to vector<128xf32>
    %24 = vector.shape_cast %23 : vector<128xf32> to vector<1x128xf32>
    %cst_11 = arith.constant 0.0102040814 : f32
    %25 = vector.broadcast %cst_11 : f32 to vector<1x128xf32>
    %26 = arith.mulf %24, %25 : vector<1x128xf32>
    %27 = arith.mulf %22, %19 : vector<128x128xf32>
    %cst_12 = arith.constant dense<0.000000e+00> : vector<128xf32>
    %28 = vector.multi_reduction <add>, %27, %cst_12 [0] : vector<128x128xf32> to vector<128xf32>
    %29 = vector.shape_cast %28 : vector<128xf32> to vector<1x128xf32>
    %cst_13 = arith.constant 0.0102040814 : f32
    %30 = vector.broadcast %cst_13 : f32 to vector<1x128xf32>
    %31 = arith.mulf %29, %30 : vector<1x128xf32>
    %32 = arith.mulf %26, %26 : vector<1x128xf32>
    %33 = arith.subf %31, %32 : vector<1x128xf32>
    %34 = vector.broadcast %26 : vector<1x128xf32> to vector<128x128xf32>
    %35 = arith.subf %19, %34 : vector<128x128xf32>
    %cst_14 = arith.constant 9.99999974E-6 : f32
    %36 = vector.broadcast %cst_14 : f32 to vector<1x128xf32>
    %37 = arith.addf %33, %36 : vector<1x128xf32>
    %38 = math.rsqrt %37 : vector<1x128xf32>
    %39 = vector.broadcast %38 : vector<1x128xf32> to vector<128x128xf32>
    %40 = arith.mulf %35, %39 : vector<128x128xf32>
    %c0_15 = arith.constant 0 : index
    %c0_16 = arith.constant 0 : index
    %41 = vector.load %arg4[%c0_15, %c0_16] : memref<1x128xf32, #tpu.memory_space<vmem>>, vector<1x128xf32>
    %42 = vector.broadcast %41 : vector<1x128xf32> to vector<128x128xf32>
    %43 = arith.mulf %40, %42 : vector<128x128xf32>
    %c0_17 = arith.constant 0 : index
    %c0_18 = arith.constant 0 : index
    %44 = vector.load %arg5[%c0_17, %c0_18] : memref<1x128xf32, #tpu.memory_space<vmem>>, vector<1x128xf32>
    %45 = vector.broadcast %44 : vector<1x128xf32> to vector<128x128xf32>
    %46 = arith.addf %43, %45 : vector<128x128xf32>
    %cst_19 = arith.constant 0.000000e+00 : f32
    %47 = vector.broadcast %cst_19 : f32 to vector<128x128xf32>
    %48 = arith.cmpf oge, %46, %47 : vector<128x128xf32>
    %cst_20 = arith.constant 2.000000e-01 : f32
    %49 = vector.broadcast %cst_20 : f32 to vector<128x128xf32>
    %50 = arith.mulf %49, %46 : vector<128x128xf32>
    %51 = arith.select %48, %46, %50 : vector<128x128xi1>, vector<128x128xf32>
    %52 = vector.shape_cast %51 : vector<128x128xf32> to vector<2x64x128xf32>
    %c0_21 = arith.constant 0 : index
    %c0_22 = arith.constant 0 : index
    %53 = vector.load %arg6[%c0_21, %c0_22] : memref<64x128xf32, #tpu.memory_space<vmem>>, vector<64x128xf32>
    %54 = vector.shape_cast %53 : vector<64x128xf32> to vector<1x64x128xf32>
    %55 = vector.broadcast %54 : vector<1x64x128xf32> to vector<2x64x128xf32>
    %56 = arith.mulf %52, %55 : vector<2x64x128xf32>
    %cst_23 = arith.constant dense<0.000000e+00> : vector<2x64xf32>
    %57 = vector.multi_reduction <add>, %56, %cst_23 [2] : vector<2x64x128xf32> to vector<2x64xf32>
    %58 = vector.shape_cast %57 : vector<2x64xf32> to vector<2x64x1xf32>
    %cst_24 = arith.constant dense<0.000000e+00> : vector<2x1xf32>
    %59 = vector.multi_reduction <add>, %58, %cst_24 [1] : vector<2x64x1xf32> to vector<2x1xf32>
    %60 = vector.shape_cast %59 : vector<2x1xf32> to vector<2x1x1xf32>
    %61 = vector.shape_cast %60 : vector<2x1x1xf32> to vector<2x1xf32>
    %c0_25 = arith.constant 0 : index
    %c0_26 = arith.constant 0 : index
    %62 = vector.load %arg7[%c0_25, %c0_26] : memref<1x1xf32, #tpu.memory_space<vmem>>, vector<1x1xf32>
    %63 = vector.broadcast %62 : vector<1x1xf32> to vector<2x1xf32>
    %64 = arith.addf %61, %63 : vector<2x1xf32>
    %65 = arith.negf %64 : vector<2x1xf32>
    %66 = math.exp %65 : vector<2x1xf32>
    %cst_27 = arith.constant 1.000000e+00 : f32
    %67 = vector.broadcast %cst_27 : f32 to vector<2x1xf32>
    %68 = arith.addf %67, %66 : vector<2x1xf32>
    %69 = arith.divf %67, %68 : vector<2x1xf32>
    %c0_28 = arith.constant 0 : index
    %c0_29 = arith.constant 0 : index
    %70 = vector.load %arg9[%c0_28, %c0_29] : memref<2x1xf32, #tpu.memory_space<vmem>>, vector<2x1xf32>
    tpu.vector_store %arg9[%c0_28, %c0_29], %69 {strides = array<i32>} : memref<2x1xf32, #tpu.memory_space<vmem>>, vector<2x1xf32>,
    return
  }
  func.func @transform_0(%arg0: i32) -> (i32, i32) {
    %c0_i32 = arith.constant 0 : i32
    %c0_i32_0 = arith.constant 0 : i32
    %c0_i32_1 = arith.constant 0 : i32
    return %c0_i32, %c0_i32_0 : i32, i32
  }
  func.func @transform_1(%arg0: i32) -> (i32, i32) {
    %c0_i32 = arith.constant 0 : i32
    %c0_i32_0 = arith.constant 0 : i32
    %c0_i32_1 = arith.constant 0 : i32
    return %c0_i32, %c0_i32_0 : i32, i32
  }
  func.func @transform_2(%arg0: i32) -> (i32, i32) {
    %c0_i32 = arith.constant 0 : i32
    %c0_i32_0 = arith.constant 0 : i32
    %c0_i32_1 = arith.constant 0 : i32
    return %c0_i32, %c0_i32_0 : i32, i32
  }
  func.func @transform_3(%arg0: i32) -> (i32, i32) {
    %c0_i32 = arith.constant 0 : i32
    %c0_i32_0 = arith.constant 0 : i32
    %c0_i32_1 = arith.constant 0 : i32
    return %c0_i32, %c0_i32_0 : i32, i32
  }
  func.func @transform_4(%arg0: i32) -> (i32, i32) {
    %c0_i32 = arith.constant 0 : i32
    %c0_i32_0 = arith.constant 0 : i32
    %c0_i32_1 = arith.constant 0 : i32
    return %c0_i32, %c0_i32_0 : i32, i32
  }
  func.func @transform_5(%arg0: i32) -> (i32, i32) {
    %c0_i32 = arith.constant 0 : i32
    %c0_i32_0 = arith.constant 0 : i32
    %c0_i32_1 = arith.constant 0 : i32
    return %c0_i32, %c0_i32_0 : i32, i32
  }
  func.func @transform_6(%arg0: i32) -> (i32, i32) {
    %c0_i32 = arith.constant 0 : i32
    %c0_i32_0 = arith.constant 0 : i32
    %c0_i32_1 = arith.constant 0 : i32
    return %c0_i32, %c0_i32_0 : i32, i32
  }
  func.func @transform_7(%arg0: i32) -> (i32, i32) {
    %c0_i32 = arith.constant 0 : i32
    %c0_i32_0 = arith.constant 0 : i32
    %c0_i32_1 = arith.constant 0 : i32
    return %c0_i32, %c0_i32_0 : i32, i32
  }
  func.func @transform_8(%arg0: i32) -> (i32, i32) {
    %c0_i32 = arith.constant 0 : i32
    %c0_i32_0 = arith.constant 0 : i32
    %c0_i32_1 = arith.constant 0 : i32
    return %c0_i32, %c0_i32_0 : i32, i32
  }
}

</mosaic_0001>

<bundles_post_ra>
// kernel: discriminator_forward.1
= control target key start
LH: loop header
LB: loop body
LE: loop exit
PB: predicated region body
PF: predicated region fallthrough
CT: control target
= control target key end

     0   :  { %vm286_vm0 = vcmask 261120   ;;  %s4114_s1 = inlined_call_operand.vmem [shape: bf16[32,128], index: 1, kind: input, shape index: {}]   ;;  %s4115_s0 = inlined_call_operand.vmem [shape: bf16[544,32], index: 0, kind: input, shape index: {}]   ;;  %s4116_s2 = inlined_call_operand.vmem [shape: bf16[1024,128], index: 2, kind: input, shape index: {}]   ;;  %s4117_s7 = inlined_call_operand.vmem [shape: f32[128,1], index: 7, kind: input, shape index: {}]   ;;  %s4118_s3 = inlined_call_operand.vmem [shape: f32[1,128], index: 3, kind: input, shape index: {}]   ;;  %s4119_s4 = inlined_call_operand.vmem [shape: f32[1,128], index: 4, kind: input, shape index: {}]   ;;  %s4120_s5 = inlined_call_operand.vmem [shape: f32[64,128], index: 5, kind: input, shape index: {}]   ;;  %s4121_s6 = inlined_call_operand.<no memory space> [shape: f32[1,1], index: 6, kind: input, shape index: {}]   ;;  %s4122_s8 = inlined_call_operand.vmem [shape: f32[2,1], index: 8, kind: output, shape index: {}]  }
   0x1   :  { %v2801_v0 = vld [vmem:[%s4114_s1] sm:$0xff]   ;;  %v2802_v1 = vld [vmem:[%s4114_s1 + $0x8] sm:$0xff]   ;;  %v2805_v4 = vld [vmem:[%s4115_s0 + $0x10] sm:$0xff]  }
   0x2   :  { %2710 = vmatprep.subr.bf16.mxu0 %v2801_v0  ;;  %v2803_v2 = vld [vmem:[%s4115_s0] sm:$0xff]   ;;  %v2804_v3 = vld [vmem:[%s4115_s0 + $0x8] sm:$0xff]   ;;  %v2806_v5 = vld [vmem:[%s4115_s0 + $0x18] sm:$0xff]  }
   0x3   :  { %2711 = vmatpush3.bf16.msra.mxu0 %v2801_v0  ;;  %2714 = vmatprep.mubr.msk.bf16.mxu0 %vm286_vm0, %v2803_v2  ;;  %v2807_v6 = vld [vmem:[%s4115_s0 + $0x20] sm:$0xff]   ;;  %v2808_v7 = vld [vmem:[%s4115_s0 + $0x28] sm:$0xff]   ;;  %v2809_v8 = vld [vmem:[%s4115_s0 + $0x30] sm:$0xff]  }
   0x4   :  { %2712 = vmatprep.subr.bf16.mxu0 %v2802_v1  ;;  %v2810_v9 = vld [vmem:[%s4115_s0 + $0x38] sm:$0xff]   ;;  %v2811_v10 = vld [vmem:[%s4115_s0 + $0x40] sm:$0xff]   ;;  %v2812_v11 = vld [vmem:[%s4115_s0 + $0x48] sm:$0xff]  }
   0x5   :  { %v2813_v12 = vld [vmem:[%s4115_s0 + $0x50] sm:$0xff]   ;;  %v2814_v13 = vld [vmem:[%s4115_s0 + $0x58] sm:$0xff]   ;;  %v2815_v14 = vld [vmem:[%s4115_s0 + $0x60] sm:$0xff]  }
   0x6   :  { %v2816_v15 = vld [vmem:[%s4115_s0 + $0x68] sm:$0xff]   ;;  %v2817_v16 = vld [vmem:[%s4115_s0 + $0x70] sm:$0xff]   ;;  %v2818_v17 = vld [vmem:[%s4115_s0 + $0x78] sm:$0xff]  }
   0x7   :  { %2713 = vmatpush3.bf16.msra.mxu0 %v2802_v1  ;;  %v2819_v18 = vld [vmem:[%s4115_s0 + $0x80] sm:$0xff]   ;;  %v2820_v19 = vld [vmem:[%s4115_s0 + $0x88] sm:$0xff]   ;;  %v2821_v20 = vld [vmem:[%s4115_s0 + $0x90] sm:$0xff]  }
   0x8   :  { %v2822_v21 = vld [vmem:[%s4115_s0 + $0x98] sm:$0xff]   ;;  %v2823_v22 = vld [vmem:[%s4115_s0 + $0xa0] sm:$0xff]   ;;  %v2824_v23 = vld [vmem:[%s4115_s0 + $0xa8] sm:$0xff]  }
   0x9   :  { %v2825_v24 = vld [vmem:[%s4115_s0 + $0xb0] sm:$0xff]   ;;  %v2826_v25 = vld [vmem:[%s4115_s0 + $0xb8] sm:$0xff]   ;;  %v2827_v26 = vld [vmem:[%s4115_s0 + $0xc0] sm:$0xff]  }
   0xa   :  { %2715 = vmatmul.mubr.msk.bf16.vlgmr.msra.gmra.mrb[0].mxu0 %vm286_vm0, %v2804_v3  ;;  %v2828_v27 = vld [vmem:[%s4115_s0 + $0xc8] sm:$0xff]   ;;  %v2829_v28 = vld [vmem:[%s4115_s0 + $0xd0] sm:$0xff]   ;;  %v2830_v29 = vld [vmem:[%s4115_s0 + $0xd8] sm:$0xff]  }
   0xb   :  { %2718 = vmatprep.mubr.msk.bf16.mxu0 %vm286_vm0, %v2805_v4  ;;  %v2831_v30 = vld [vmem:[%s4115_s0 + $0xe0] sm:$0xff]   ;;  %v2832_v31 = vld [vmem:[%s4115_s0 + $0xe8] sm:$0xff]   ;;  %v2833_v32 = vld [vmem:[%s4115_s0 + $0xf0] sm:$0xff]  }
   0xc   :  { %v2834_v33 = vld [vmem:[%s4115_s0 + $0xf8] sm:$0xff]   ;;  %v2835_v34 = vld [vmem:[%s4115_s0 + $0x100] sm:$0xff]   ;;  %v2836_v35 = vld [vmem:[%s4115_s0 + $0x108] sm:$0xff]  }
   0xd   :  { %v2837_v36 = vld [vmem:[%s4116_s2 + $0x140] sm:$0xff]   ;;  %v2839_v38 = vld [vmem:[%s4116_s2 + $0x148] sm:$0xff]   ;;  %v2845_v44 = vld [vmem:[%s4116_s2 + $0x50] sm:$0xff]  }
   0xe   :  { %v2838_v37 = vld [vmem:[%s4116_s2 + $0x100] sm:$0xff]   ;;  %2582 = vmatprep.subr.bf16.mxu0 %v2837_v36  ;;  %v2840_v39 = vld [vmem:[%s4116_s2 + $0x108] sm:$0xff]   ;;  %v2846_v45 = vld [vmem:[%s4116_s2 + $0x10] sm:$0xff]  }
   0xf   :  { %2583 = vmatpush3.bf16.msra.mxu0 %v2838_v37  ;;  %v2841_v40 = vld [vmem:[%s4116_s2 + $0x40] sm:$0xff]   ;;  %v2843_v42 = vld [vmem:[%s4116_s2 + $0x48] sm:$0xff]   ;;  %v2847_v46 = vld [vmem:[%s4116_s2 + $0x150] sm:$0xff]  }
  0x10   :  { %v2842_v41 = vld [vmem:[%s4116_s2] sm:$0xff]   ;;  %2584 = vmatprep.subr.bf16.mxu0 %v2839_v38  ;;  %2454 = vmatprep.subr.bf16.mxu1 %v2841_v40  ;;  %v2844_v43 = vld [vmem:[%s4116_s2 + $0x8] sm:$0xff]   ;;  %v2849_v47 = vld [vmem:[%s4116_s2 + $0x110] sm:$0xff]  }
  0x11   :  { %2455 = vmatpush3.bf16.msra.mxu1 %v2842_v41  ;;  %v2848_v48 = vld [vmem:[%s4116_s2 + $0x58] sm:$0xff]   ;;  %v2852_v52 = vld [vmem:[%s4116_s2 + $0x60] sm:$0xff]   ;;  %v2856_v56 = vld [vmem:[%s4116_s2 + $0x68] sm:$0xff]  }
  0x12   :  { %2719 = vmatmul.mubr.msk.bf16.gmra.mrb[4].mxu0 %vm286_vm0, %v2806_v5  ;;  %2456 = vmatprep.subr.bf16.mxu1 %v2843_v42  ;;  %v2850_v49 = vld [vmem:[%s4116_s2 + $0x18] sm:$0xff]   ;;  %v2854_v53 = vld [vmem:[%s4116_s2 + $0x20] sm:$0xff]   ;;  %v2858_v57 = vld [vmem:[%s4116_s2 + $0x28] sm:$0xff]  }
  0x13   :  { %2722 = vmatprep.mubr.msk.bf16.mxu0 %vm286_vm0, %v2807_v6  ;;  %2585 = vmatpush3.bf16.msra.mxu0 %v2840_v39  ;;  %v2851_v50 = vld [vmem:[%s4116_s2 + $0x158] sm:$0xff]   ;;  %v2855_v54 = vld [vmem:[%s4116_s2 + $0x160] sm:$0xff]   ;;  %v2859_v58 = vld [vmem:[%s4116_s2 + $0x168] sm:$0xff]  }
  0x14   :  { %2586 = vmatprep.subr.bf16.mxu0 %v2847_v46  ;;  %v2853_v51 = vld [vmem:[%s4116_s2 + $0x118] sm:$0xff]   ;;  %v2857_v55 = vld [vmem:[%s4116_s2 + $0x120] sm:$0xff]   ;;  %v2861_v59 = vld [vmem:[%s4116_s2 + $0x128] sm:$0xff]  }
  0x15   :  { %2457 = vmatpush3.bf16.msra.mxu1 %v2844_v43  ;;  %v2860_v60 = vld [vmem:[%s4116_s2 + $0x70] sm:$0xff]   ;;  %v2864_v0 = vld [vmem:[%s4116_s2 + $0x78] sm:$0xff]   ;;  %v2868_v4 = vld [vmem:[%s4116_s2 + $0xc0] sm:$0xff]  }
  0x16   :  { %2458 = vmatprep.subr.bf16.mxu1 %v2845_v44  ;;  %v2862_v61 = vld [vmem:[%s4116_s2 + $0x30] sm:$0xff]   ;;  %v2866_v1 = vld [vmem:[%s4116_s2 + $0x38] sm:$0xff]   ;;  %v3231_v39 = vld [vmem:[%s4116_s2 + $0x1c0] sm:$0xff]  }
  0x17   :  { %2587 = vmatpush3.bf16.msra.mxu0 %v2849_v47  ;;  %v2863_v62 = vld [vmem:[%s4116_s2 + $0x170] sm:$0xff]   ;;  %v2867_v2 = vld [vmem:[%s4116_s2 + $0x178] sm:$0xff]  }
  0x18   :  { %2588 = vmatprep.subr.bf16.mxu0 %v2851_v50  ;;  %v2865_v63 = vld [vmem:[%s4116_s2 + $0x130] sm:$0xff]   ;;  %v2869_v3 = vld [vmem:[%s4116_s2 + $0x138] sm:$0xff]  }
  0x19   :  { %2459 = vmatpush3.bf16.msra.mxu1 %v2846_v45 }
  0x1a   :  { %2723 = vmatmul.mubr.msk.bf16.gmra.mrb[8].mxu0 %vm286_vm0, %v2808_v7  ;;  %2460 = vmatprep.subr.bf16.mxu1 %v2848_v48 }
  0x1b   :  { %2726 = vmatprep.mubr.msk.bf16.mxu0 %vm286_vm0, %v2809_v8  ;;  %2589 = vmatpush3.bf16.msra.mxu0 %v2853_v51  ;;  %v2870_v51 = vld [vmem:[%s4116_s2 + $0x80] sm:$0xff]  }
  0x1c   :  { %2590 = vmatprep.subr.bf16.mxu0 %v2855_v54 }
  0x1d   :  { %2461 = vmatpush3.bf16.msra.mxu1 %v2850_v49 }
  0x1e   :  { %2462 = vmatprep.subr.bf16.mxu1 %v2852_v52 }
  0x1f   :  { %2591 = vmatpush3.bf16.msra.mxu0 %v2857_v55 }
  0x20   :  { %2592 = vmatprep.subr.bf16.mxu0 %v2859_v58 }
  0x21   :  { %2463 = vmatpush3.bf16.msra.mxu1 %v2854_v53 }
  0x22   :  { %2727 = vmatmul.mubr.msk.bf16.gmra.mrb[12].mxu0 %vm286_vm0, %v2810_v9  ;;  %2464 = vmatprep.subr.bf16.mxu1 %v2856_v56 }
  0x23   :  { %2730 = vmatprep.mubr.msk.bf16.mxu0 %vm286_vm0, %v2811_v10  ;;  %2593 = vmatpush3.bf16.msra.mxu0 %v2861_v59 }
  0x24   :  { %2594 = vmatprep.subr.bf16.mxu0 %v2863_v62 }
  0x25   :  { %2465 = vmatpush3.bf16.msra.mxu1 %v2858_v57 }
  0x26   :  { %2466 = vmatprep.subr.bf16.mxu1 %v2860_v60 }
  0x27   :  { %2595 = vmatpush3.bf16.msra.mxu0 %v2865_v63 }
  0x28   :  { %2596 = vmatprep.subr.bf16.mxu0 %v2867_v2 }
  0x29   :  { %2467 = vmatpush3.bf16.msra.mxu1 %v2862_v61 }
  0x2a   :  { %2731 = vmatmul.mubr.msk.bf16.gmra.mrb[16].mxu0 %vm286_vm0, %v2812_v11  ;;  %2468 = vmatprep.subr.bf16.mxu1 %v2864_v0 }
  0x2b   :  { %2734 = vmatprep.mubr.msk.bf16.mxu0 %vm286_vm0, %v2813_v12  ;;  %2597 = vmatpush3.bf16.msra.mxu0 %v2869_v3 }
  0x2c   :  { %2646 = vmatprep.subr.bf16.mxu0 %v3231_v39 }
  0x2d   :  { %2469 = vmatpush3.bf16.msra.mxu1 %v2866_v1 }
  0x2e   :  { %2518 = vmatprep.subr.bf16.mxu1 %v2868_v4 }
  0x32   :  { %2735 = vmatmul.mubr.msk.bf16.gmra.mrb[20].mxu0 %vm286_vm0, %v2814_v13 }
  0x33   :  { %2738 = vmatprep.mubr.msk.bf16.mxu0 %vm286_vm0, %v2815_v14 }
  0x3a   :  { %2739 = vmatmul.mubr.msk.bf16.gmra.mrb[24].mxu0 %vm286_vm0, %v2816_v15 }
  0x3b   :  { %2742 = vmatprep.mubr.msk.bf16.mxu0 %vm286_vm0, %v2817_v16 }
  0x42   :  { %2743 = vmatmul.mubr.msk.bf16.gmra.mrb[28].mxu0 %vm286_vm0, %v2818_v17 }
  0x43   :  { %2746 = vmatprep.mubr.msk.bf16.mxu0 %vm286_vm0, %v2819_v18 }
  0x4a   :  { %2747 = vmatmul.mubr.msk.bf16.gmra.mrb[32].mxu0 %vm286_vm0, %v2820_v19 }
  0x4b   :  { %2750 = vmatprep.mubr.msk.bf16.mxu0 %vm286_vm0, %v2821_v20 }
  0x52   :  { %2751 = vmatmul.mubr.msk.bf16.gmra.mrb[36].mxu0 %vm286_vm0, %v2822_v21 }
  0x53   :  { %2754 = vmatprep.mubr.msk.bf16.mxu0 %vm286_vm0, %v2823_v22 }
  0x5a   :  { %2755 = vmatmul.mubr.msk.bf16.gmra.mrb[40].mxu0 %vm286_vm0, %v2824_v23 }
  0x5b   :  { %2758 = vmatprep.mubr.msk.bf16.mxu0 %vm286_vm0, %v2825_v24 }
  0x62   :  { %2759 = vmatmul.mubr.msk.bf16.gmra.mrb[44].mxu0 %vm286_vm0, %v2826_v25 }
  0x63   :  { %2762 = vmatprep.mubr.msk.bf16.mxu0 %vm286_vm0, %v2827_v26 }
  0x6a   :  { %2763 = vmatmul.mubr.msk.bf16.gmra.mrb[48].mxu0 %vm286_vm0, %v2828_v27 }
  0x6b   :  { %2766 = vmatprep.mubr.msk.bf16.mxu0 %vm286_vm0, %v2829_v28 }
  0x72   :  { %2767 = vmatmul.mubr.msk.bf16.gmra.mrb[52].mxu0 %vm286_vm0, %v2830_v29 }
  0x73   :  { %2770 = vmatprep.mubr.msk.bf16.mxu0 %vm286_vm0, %v2831_v30 }
  0x7a   :  { %2771 = vmatmul.mubr.msk.bf16.gmra.mrb[56].mxu0 %vm286_vm0, %v2832_v31 }
  0x7b   :  { %2774 = vmatprep.mubr.msk.bf16.mxu0 %vm286_vm0, %v2833_v32 }
  0x82   :  { %2775 = vmatmul.mubr.msk.bf16.gmra.mrb[60].mxu0 %vm286_vm0, %v2834_v33 }
  0x83   :  { %2778 = vmatprep.mubr.msk.bf16.mxu0 %vm286_vm0, %v2835_v34 }
  0x8a   :  { %2779 = vmatmul.mubr.msk.bf16.gmra.mrb[64].mxu0 %vm286_vm0, %v2836_v35 }
  0xdd   :  { %v2716_v5 = vpop.f32.mrb[0].mxu0 }
  0xde   :  { %v764_v6 = vmul.f32 0.2, %v2716_v5  ;;  %v423_v7 = vpop.f32.mrb[1].mxu0  ;;  %vm696_vm1 = vcmp.ge.f32.partialorder %v2716_v5, 0.0 }
  0xdf   :  { %v762_v8 = vmul.f32 0.2, %v423_v7  ;;  %v2717_v9 = vpop.f32.mrb[2].mxu0  ;;  %vm694_vm2 = vcmp.ge.f32.partialorder %v423_v7, 0.0 }
  0xe0   :  { %vm697_vm3 = vcmp.ge.f32.partialorder %v2717_v9, 0.0  ;;  %v765_v10 = vmul.f32 0.2, %v2717_v9  ;;  %v426_v11 = vpop.f32.mrb[3].mxu0  ;;  %v3198_v13 = vsel %vm696_vm1, %v2716_v5, %v764_v6 }
  0xe1   :  { %vm695_vm4 = vcmp.ge.f32.partialorder %v426_v11, 0.0  ;;  %v763_v12 = vmul.f32 0.2, %v426_v11  ;;  %v3202_v15 = vsel %vm694_vm2, %v423_v7, %v762_v8 }
  0xe2   :  { %v3200_v14 = vsel %vm697_vm3, %v2717_v9, %v765_v10 }
  0xe3   :  { %v3204_v16 = vsel %vm695_vm4, %v426_v11, %v763_v12 }
  0xe5   :  { %v2720_v20 = vpop.f32.mrb[4].mxu0 }
  0xe6   :  { %v768_v21 = vmul.f32 0.2, %v2720_v20  ;;  %v439_v22 = vpop.f32.mrb[5].mxu0  ;;  %vm700_vm5 = vcmp.ge.f32.partialorder %v2720_v20, 0.0 }
  0xe7   :  { %vm698_vm6 = vcmp.ge.f32.partialorder %v439_v22, 0.0  ;;  %v766_v23 = vmul.f32 0.2, %v439_v22  ;;  %v2721_v24 = vpop.f32.mrb[6].mxu0 }
  0xe8   :  { %vm701_vm7 = vcmp.ge.f32.partialorder %v2721_v24, 0.0  ;;  %v769_v25 = vmul.f32 0.2, %v2721_v24  ;;  %v442_v26 = vpop.f32.mrb[7].mxu0  ;;  %v3214_v29 = vsel %vm700_vm5, %v2720_v20, %v768_v21 }
  0xe9   :  { %v3212_v27 = vsel %vm698_vm6, %v439_v22, %v766_v23  ;;  %vm699_vm8 = vcmp.ge.f32.partialorder %v442_v26, 0.0  ;;  %v767_v28 = vmul.f32 0.2, %v442_v26 }
  0xea   :  { %v3218_v31 = vsel %vm701_vm7, %v2721_v24, %v769_v25 }
  0xeb   :  { %v3220_v32 = vsel %vm699_vm8, %v442_v26, %v767_v28 }
  0xed   :  { %v2724_v36 = vpop.f32.mrb[8].mxu0 }
  0xee   :  { %v772_v37 = vmul.f32 0.2, %v2724_v36  ;;  %v455_v38 = vpop.f32.mrb[9].mxu0  ;;  %vm704_vm9 = vcmp.ge.f32.partialorder %v2724_v36, 0.0 }
  0xef   :  { %vm702_vm10 = vcmp.ge.f32.partialorder %v455_v38, 0.0  ;;  %v770_v40 = vmul.f32 0.2, %v455_v38  ;;  %v2725_v41 = vpop.f32.mrb[10].mxu0 }
  0xf0   :  { %vm705_vm11 = vcmp.ge.f32.partialorder %v2725_v41, 0.0  ;;  %v773_v42 = vmul.f32 0.2, %v2725_v41  ;;  %v458_v43 = vpop.f32.mrb[11].mxu0  ;;  %v3236_v46 = vsel %vm704_vm9, %v2724_v36, %v772_v37 }
  0xf1   :  { %v3234_v44 = vsel %vm702_vm10, %v455_v38, %v770_v40  ;;  %vm703_vm12 = vcmp.ge.f32.partialorder %v458_v43, 0.0  ;;  %v771_v45 = vmul.f32 0.2, %v458_v43  ;;  %4152 = vst [vmem:[#allocation4_spill] sm:$0xff] %v3236_v46 }
  0xf2   :  { %4151 = vst [vmem:[#allocation3_spill] sm:$0xff] %v3234_v44  ;;  %v3238_v47 = vsel %vm705_vm11, %v2725_v41, %v773_v42  ;;  %v3544_v44 = vld [vmem:[%s4116_s2 + $0x1a8] sm:$0xff]  }
  0xf3   :  { %4153 = vst [vmem:[#allocation5_spill] sm:$0xff] %v3238_v47  ;;  %v3242_v49 = vsel %vm703_vm12, %v458_v43, %v771_v45 }
  0xf5   :  { %v2728_v53 = vpop.f32.mrb[12].mxu0 }
  0xf6   :  { %v776_v54 = vmul.f32 0.2, %v2728_v53  ;;  %v471_v55 = vpop.f32.mrb[13].mxu0  ;;  %vm708_vm13 = vcmp.ge.f32.partialorder %v2728_v53, 0.0 }
  0xf7   :  { %vm706_vm14 = vcmp.ge.f32.partialorder %v471_v55, 0.0  ;;  %v774_v56 = vmul.f32 0.2, %v471_v55  ;;  %v2729_v57 = vpop.f32.mrb[14].mxu0 }
  0xf8   :  { %vm709_vm15 = vcmp.ge.f32.partialorder %v2729_v57, 0.0  ;;  %v777_v58 = vmul.f32 0.2, %v2729_v57  ;;  %v474_v59 = vpop.f32.mrb[15].mxu0  ;;  %v3252_v62 = vsel %vm708_vm13, %v2728_v53, %v776_v54 }
  0xf9   :  { %v3250_v60 = vsel %vm706_vm14, %v471_v55, %v774_v56  ;;  %vm707_vm0 = vcmp.ge.f32.partialorder %v474_v59, 0.0  ;;  %v775_v61 = vmul.f32 0.2, %v474_v59  ;;  %4155 = vst [vmem:[#allocation7_spill] sm:$0xff] %v3252_v62 }
  0xfa   :  { %4154 = vst [vmem:[#allocation6_spill] sm:$0xff] %v3250_v60  ;;  %v3254_v63 = vsel %vm709_vm15, %v2729_v57, %v777_v58  ;;  %v2871_v60 = vld [vmem:[%s4116_s2 + $0xc8] sm:$0xff]  }
  0xfb   :  { %4156 = vst [vmem:[#allocation8_spill] sm:$0xff] %v3254_v63  ;;  %v3258_v1 = vsel %vm707_vm0, %v474_v59, %v775_v61 }
  0xfc   :  { %4157 = vst [vmem:[#allocation9_spill] sm:$0xff] %v3258_v1 }
  0xfd   :  { %v2732_v5 = vpop.f32.mrb[16].mxu0 }
  0xfe   :  { %v780_v6 = vmul.f32 0.2, %v2732_v5  ;;  %v487_v7 = vpop.f32.mrb[17].mxu0  ;;  %vm712_vm1 = vcmp.ge.f32.partialorder %v2732_v5, 0.0 }
  0xff   :  { %vm710_vm2 = vcmp.ge.f32.partialorder %v487_v7, 0.0  ;;  %v778_v8 = vmul.f32 0.2, %v487_v7  ;;  %v2733_v9 = vpop.f32.mrb[18].mxu0 }
 0x100   :  { %vm713_vm3 = vcmp.ge.f32.partialorder %v2733_v9, 0.0  ;;  %v781_v10 = vmul.f32 0.2, %v2733_v9  ;;  %v490_v11 = vpop.f32.mrb[19].mxu0  ;;  %v3268_v21 = vsel %vm712_vm1, %v2732_v5, %v780_v6 }
 0x101   :  { %v3266_v12 = vsel %vm710_vm2, %v487_v7, %v778_v8  ;;  %vm711_vm4 = vcmp.ge.f32.partialorder %v490_v11, 0.0  ;;  %v779_v20 = vmul.f32 0.2, %v490_v11 }
 0x102   :  { %4158 = vst [vmem:[#allocation10_spill] sm:$0xff] %v3266_v12  ;;  %v3270_v22 = vsel %vm713_vm3, %v2733_v9, %v781_v10 }
 0x103   :  { %v3274_v24 = vsel %vm711_vm4, %v490_v11, %v779_v20 }
 0x105   :  { %v2736_v28 = vpop.f32.mrb[20].mxu0 }
 0x106   :  { %v784_v36 = vmul.f32 0.2, %v2736_v28  ;;  %v503_v37 = vpop.f32.mrb[21].mxu0  ;;  %vm716_vm5 = vcmp.ge.f32.partialorder %v2736_v28, 0.0 }
 0x107   :  { %vm714_vm6 = vcmp.ge.f32.partialorder %v503_v37, 0.0  ;;  %v782_v38 = vmul.f32 0.2, %v503_v37  ;;  %v2737_v40 = vpop.f32.mrb[22].mxu0 }
 0x108   :  { %vm717_vm7 = vcmp.ge.f32.partialorder %v2737_v40, 0.0  ;;  %v785_v41 = vmul.f32 0.2, %v2737_v40  ;;  %v506_v42 = vpop.f32.mrb[23].mxu0  ;;  %v3282_v53 = vsel %vm716_vm5, %v2736_v28, %v784_v36 }
 0x109   :  { %v3280_v43 = vsel %vm714_vm6, %v503_v37, %v782_v38  ;;  %vm715_vm8 = vcmp.ge.f32.partialorder %v506_v42, 0.0  ;;  %v783_v45 = vmul.f32 0.2, %v506_v42 }
 0x10a   :  { %v3284_v54 = vsel %vm717_vm7, %v2737_v40, %v785_v41 }
 0x10b   :  { %v3288_v56 = vsel %vm715_vm8, %v506_v42, %v783_v45 }
 0x10d   :  { %v2740_v61 = vpop.f32.mrb[24].mxu0 }
 0x10e   :  { %v788_v5 = vmul.f32 0.2, %v2740_v61  ;;  %v519_v6 = vpop.f32.mrb[25].mxu0  ;;  %vm720_vm9 = vcmp.ge.f32.partialorder %v2740_v61, 0.0 }
 0x10f   :  { %vm718_vm10 = vcmp.ge.f32.partialorder %v519_v6, 0.0  ;;  %v786_v7 = vmul.f32 0.2, %v519_v6  ;;  %v2741_v8 = vpop.f32.mrb[26].mxu0 }
 0x110   :  { %vm721_vm11 = vcmp.ge.f32.partialorder %v2741_v8, 0.0  ;;  %v789_v9 = vmul.f32 0.2, %v2741_v8  ;;  %v522_v10 = vpop.f32.mrb[27].mxu0  ;;  %v3298_v28 = vsel %vm720_vm9, %v2740_v61, %v788_v5 }
 0x111   :  { %v3296_v11 = vsel %vm718_vm10, %v519_v6, %v786_v7  ;;  %vm719_vm12 = vcmp.ge.f32.partialorder %v522_v10, 0.0  ;;  %v787_v20 = vmul.f32 0.2, %v522_v10 }
 0x112   :  { %v3300_v36 = vsel %vm721_vm11, %v2741_v8, %v789_v9 }
 0x113   :  { %4159 = vst [vmem:[#allocation11_spill] sm:$0xff] %v3300_v36  ;;  %v3304_v38 = vsel %vm719_vm12, %v522_v10, %v787_v20 }
 0x115   :  { %v2744_v45 = vpop.f32.mrb[28].mxu0 }
 0x116   :  { %v792_v6 = vmul.f32 0.2, %v2744_v45  ;;  %v535_v61 = vpop.f32.mrb[29].mxu0  ;;  %vm724_vm13 = vcmp.ge.f32.partialorder %v2744_v45, 0.0 }
 0x117   :  { %vm722_vm14 = vcmp.ge.f32.partialorder %v535_v61, 0.0  ;;  %v790_v5 = vmul.f32 0.2, %v535_v61  ;;  %v2745_v7 = vpop.f32.mrb[30].mxu0 }
 0x118   :  { %vm725_vm15 = vcmp.ge.f32.partialorder %v2745_v7, 0.0  ;;  %v793_v8 = vmul.f32 0.2, %v2745_v7  ;;  %v538_v9 = vpop.f32.mrb[31].mxu0  ;;  %v3314_v23 = vsel %vm724_vm13, %v2744_v45, %v792_v6 }
 0x119   :  { %v3312_v10 = vsel %vm722_vm14, %v535_v61, %v790_v5  ;;  %vm723_vm0 = vcmp.ge.f32.partialorder %v538_v9, 0.0  ;;  %v791_v20 = vmul.f32 0.2, %v538_v9  ;;  %4161 = vst [vmem:[#allocation13_spill] sm:$0xff] %v3314_v23 }
 0x11a   :  { %4160 = vst [vmem:[#allocation12_spill] sm:$0xff] %v3312_v10  ;;  %v3316_v4 = vsel %vm725_vm15, %v2745_v7, %v793_v8 }
 0x11b   :  { %4162 = vst [vmem:[#allocation14_spill] sm:$0xff] %v3316_v4  ;;  %v3320_v52 = vsel %vm723_vm0, %v538_v9, %v791_v20 }
 0x11c   :  { %4163 = vst [vmem:[#allocation15_spill] sm:$0xff] %v3320_v52 }
 0x11d   :  { %v2748_v5 = vpop.f32.mrb[32].mxu0 }
 0x11e   :  { %v796_v42 = vmul.f32 0.2, %v2748_v5  ;;  %v551_v45 = vpop.f32.mrb[33].mxu0  ;;  %vm728_vm1 = vcmp.ge.f32.partialorder %v2748_v5, 0.0 }
 0x11f   :  { %vm726_vm2 = vcmp.ge.f32.partialorder %v551_v45, 0.0  ;;  %v794_v6 = vmul.f32 0.2, %v551_v45  ;;  %v2749_v7 = vpop.f32.mrb[34].mxu0 }
 0x120   :  { %vm729_vm3 = vcmp.ge.f32.partialorder %v2749_v7, 0.0  ;;  %v797_v8 = vmul.f32 0.2, %v2749_v7  ;;  %v554_v9 = vpop.f32.mrb[35].mxu0  ;;  %v3330_v35 = vsel %vm728_vm1, %v2748_v5, %v796_v42 }
 0x121   :  { %v3328_v20 = vsel %vm726_vm2, %v551_v45, %v794_v6  ;;  %vm727_vm4 = vcmp.ge.f32.partialorder %v554_v9, 0.0  ;;  %v795_v40 = vmul.f32 0.2, %v554_v9 }
 0x122   :  { %4164 = vst [vmem:[#allocation16_spill] sm:$0xff] %v3328_v20  ;;  %v3332_v57 = vsel %vm729_vm3, %v2749_v7, %v797_v8 }
 0x123   :  { %v3336_v30 = vsel %vm727_vm4, %v554_v9, %v795_v40 }
 0x124   :  { %4165 = vst [vmem:[#allocation17_spill] sm:$0xff] %v3336_v30 }
 0x125   :  { %v2752_v3 = vpop.f32.mrb[36].mxu0 }
 0x126   :  { %v800_v45 = vmul.f32 0.2, %v2752_v3  ;;  %v567_v6 = vpop.f32.mrb[37].mxu0  ;;  %vm732_vm5 = vcmp.ge.f32.partialorder %v2752_v3, 0.0 }
 0x127   :  { %vm730_vm6 = vcmp.ge.f32.partialorder %v567_v6, 0.0  ;;  %v798_v42 = vmul.f32 0.2, %v567_v6  ;;  %v2753_v5 = vpop.f32.mrb[38].mxu0 }
 0x128   :  { %vm733_vm7 = vcmp.ge.f32.partialorder %v2753_v5, 0.0  ;;  %v801_v7 = vmul.f32 0.2, %v2753_v5  ;;  %v570_v8 = vpop.f32.mrb[39].mxu0  ;;  %v3344_v9 = vsel %vm732_vm5, %v2752_v3, %v800_v45 }
 0x129   :  { %v3342_v48 = vsel %vm730_vm6, %v567_v6, %v798_v42  ;;  %vm731_vm8 = vcmp.ge.f32.partialorder %v570_v8, 0.0  ;;  %v799_v40 = vmul.f32 0.2, %v570_v8 }
 0x12a   :  { %v3348_v2 = vsel %vm733_vm7, %v2753_v5, %v801_v7 }
 0x12b   :  { %v3350_v50 = vsel %vm731_vm8, %v570_v8, %v799_v40 }
 0x12d   :  { %v2756_v42 = vpop.f32.mrb[40].mxu0 }
 0x12e   :  { %v804_v41 = vmul.f32 0.2, %v2756_v42  ;;  %v583_v3 = vpop.f32.mrb[41].mxu0  ;;  %vm736_vm9 = vcmp.ge.f32.partialorder %v2756_v42, 0.0 }
 0x12f   :  { %vm734_vm10 = vcmp.ge.f32.partialorder %v583_v3, 0.0  ;;  %v802_v45 = vmul.f32 0.2, %v583_v3  ;;  %v2757_v33 = vpop.f32.mrb[42].mxu0 }
 0x130   :  { %vm737_vm11 = vcmp.ge.f32.partialorder %v2757_v33, 0.0  ;;  %v805_v5 = vmul.f32 0.2, %v2757_v33  ;;  %v586_v7 = vpop.f32.mrb[43].mxu0  ;;  %v3360_v37 = vsel %vm736_vm9, %v2756_v42, %v804_v41 }
 0x131   :  { %v3358_v8 = vsel %vm734_vm10, %v583_v3, %v802_v45  ;;  %vm735_vm12 = vcmp.ge.f32.partialorder %v586_v7, 0.0  ;;  %v803_v40 = vmul.f32 0.2, %v586_v7 }
 0x132   :  { %v3362_v34 = vsel %vm737_vm11, %v2757_v33, %v805_v5 }
 0x133   :  { %v3366_v17 = vsel %vm735_vm12, %v586_v7, %v803_v40 }
 0x135   :  { %v2760_v45 = vpop.f32.mrb[44].mxu0 }
 0x136   :  { %v808_v18 = vmul.f32 0.2, %v2760_v45  ;;  %v599_v41 = vpop.f32.mrb[45].mxu0  ;;  %vm740_vm13 = vcmp.ge.f32.partialorder %v2760_v45, 0.0 }
 0x137   :  { %vm738_vm14 = vcmp.ge.f32.partialorder %v599_v41, 0.0  ;;  %v806_v33 = vmul.f32 0.2, %v599_v41  ;;  %v2761_v42 = vpop.f32.mrb[46].mxu0 }
 0x138   :  { %vm741_vm15 = vcmp.ge.f32.partialorder %v2761_v42, 0.0  ;;  %v809_v5 = vmul.f32 0.2, %v2761_v42  ;;  %v602_v7 = vpop.f32.mrb[47].mxu0  ;;  %v3376_v26 = vsel %vm740_vm13, %v2760_v45, %v808_v18 }
 0x139   :  { %v3374_v40 = vsel %vm738_vm14, %v599_v41, %v806_v33  ;;  %vm739_vm0 = vcmp.ge.f32.partialorder %v602_v7, 0.0  ;;  %v807_v25 = vmul.f32 0.2, %v602_v7 }
 0x13a   :  { %v3378_v19 = vsel %vm741_vm15, %v2761_v42, %v809_v5 }
 0x13b   :  { %v3382_v55 = vsel %vm739_vm0, %v602_v7, %v807_v25 }
 0x13d   :  { %v2764_v33 = vpop.f32.mrb[48].mxu0 }
 0x13e   :  { %v615_v6 = vpop.f32.mrb[49].mxu0  ;;  %v812_v18 = vmul.f32 0.2, %v2764_v33  ;;  %vm744_vm2 = vcmp.ge.f32.partialorder %v2764_v33, 0.0 }
 0x13f   :  { %vm742_vm1 = vcmp.ge.f32.partialorder %v615_v6, 0.0  ;;  %v810_v45 = vmul.f32 0.2, %v615_v6  ;;  %v2765_v42 = vpop.f32.mrb[50].mxu0 }
 0x140   :  { %v618_v5 = vpop.f32.mrb[51].mxu0  ;;  %v3394_v58 = vsel %vm744_vm2, %v2764_v33, %v812_v18  ;;  %v813_v61 = vmul.f32 0.2, %v2765_v42  ;;  %vm745_vm4 = vcmp.ge.f32.partialorder %v2765_v42, 0.0 }
 0x141   :  { %v3390_v3 = vsel %vm742_vm1, %v615_v6, %v810_v45  ;;  %vm743_vm3 = vcmp.ge.f32.partialorder %v618_v5, 0.0  ;;  %v811_v25 = vmul.f32 0.2, %v618_v5 }
 0x143   :  { %v3396_v0 = vsel %vm743_vm3, %v618_v5, %v811_v25  ;;  %v881_v25 = vsel %vm745_vm4, %v2765_v42, %v813_v61  ;;  %v4166_v61 = vpack.c.bf16 %v3332_v57, %v3330_v35 }
 0x145   :  { %v2768_v59 = vpop.f32.mrb[52].mxu0 }
 0x146   :  { %v816_v12 = vmul.f32 0.2, %v2768_v59  ;;  %v631_v6 = vpop.f32.mrb[53].mxu0  ;;  %vm748_vm5 = vcmp.ge.f32.partialorder %v2768_v59, 0.0 }
 0x147   :  { %v814_v45 = vmul.f32 0.2, %v631_v6  ;;  %v2769_v30 = vpop.f32.mrb[54].mxu0  ;;  %vm746_vm6 = vcmp.ge.f32.partialorder %v631_v6, 0.0 }
 0x148   :  { %vm749_vm7 = vcmp.ge.f32.partialorder %v2769_v30, 0.0  ;;  %v817_v33 = vmul.f32 0.2, %v2769_v30  ;;  %v634_v18 = vpop.f32.mrb[55].mxu0  ;;  %v884_v41 = vsel %vm748_vm5, %v2768_v59, %v816_v12 }
 0x149   :  { %vm747_vm8 = vcmp.ge.f32.partialorder %v634_v18, 0.0  ;;  %v815_v5 = vmul.f32 0.2, %v634_v18  ;;  %v882_v7 = vsel %vm746_vm6, %v631_v6, %v814_v45 }
 0x14a   :  { %v885_v62 = vsel %vm749_vm7, %v2769_v30, %v817_v33  ;;  %v899_v63 = vpack.c.bf16 %v882_v7, %v881_v25  ;;  %v3414_v30 = vld [vmem:[%s4116_s2 + $0x180] sm:$0xff]   ;;  %v3452_v25 = vld [vmem:[%s4116_s2 + $0x1d0] sm:$0xff]  }
 0x14b   :  { %v883_v4 = vsel %vm747_vm8, %v634_v18, %v815_v5  ;;  %v911_v20 = vpack.c.bf16 %v885_v62, %v884_v41  ;;  %v2875_v5 = vld [vmem:[%s4116_s2 + $0xd8] sm:$0xff]  }
 0x14c   :  { %v903_v1 = vpack.c.bf16 %v883_v4, %v882_v7  ;;  %1506 = vmatprep.mubr.bf16.mxu1 %v899_v63  ;;  %v907_v52 = vpack.c.bf16 %v884_v41, %v883_v4  ;;  %v2872_v63 = vld [vmem:[%s4116_s2 + $0x88] sm:$0xff]  }
 0x14d   :  { %v2772_v23 = vpop.f32.mrb[56].mxu0  ;;  %1507 = vmatmul.mubr.bf16.vlgmr.msra.gmra.mrb[0].mxu1 %v4166_v61  ;;  %v3422_v4 = vld [vmem:[%s4116_s2 + $0x1c8] sm:$0xff]  }
 0x14e   :  { %vm752_vm9 = vcmp.ge.f32.partialorder %v2772_v23, 0.0  ;;  %v820_v12 = vmul.f32 0.2, %v2772_v23  ;;  %2519 = vmatpush3.bf16.msra.mxu1 %v2870_v51  ;;  %v647_v59 = vpop.f32.mrb[57].mxu0  ;;  %1514 = vmatprep.mubr.bf16.mxu1 %v907_v52  ;;  %v2873_v51 = vld [vmem:[%s4116_s2 + $0xd0] sm:$0xff]   ;;  %v4167_v52 = vpack.c.bf16 %v3342_v48, %v3332_v57 }
 0x14f   :  { %vm750_vm10 = vcmp.ge.f32.partialorder %v647_v59, 0.0  ;;  %v818_v35 = vmul.f32 0.2, %v647_v59  ;;  %1700 = vmatprep.mubr.bf16.mxu0 %v903_v1  ;;  %v2773_v41 = vpop.f32.mrb[58].mxu0  ;;  %2520 = vmatprep.subr.bf16.mxu1 %v2871_v60  ;;  %v3436_v60 = vld [vmem:[%s4116_s2 + $0x188] sm:$0xff]   ;;  %v2874_v57 = vld [vmem:[%s4116_s2 + $0x90] sm:$0xff]  }
 0x150   :  { %v3427_v42 = vsel %vm752_vm9, %v2772_v23, %v820_v12  ;;  %1701 = vmatmul.mubr.bf16.vlgmr.msra.gmra.mrb[68].mxu0 %v4167_v52  ;;  %vm753_vm11 = vcmp.ge.f32.partialorder %v2773_v41, 0.0  ;;  %v821_v7 = vmul.f32 0.2, %v2773_v41  ;;  %v650_v6 = vpop.f32.mrb[59].mxu0 }
 0x151   :  { %v886_v45 = vsel %vm750_vm10, %v647_v59, %v818_v35  ;;  %1708 = vmatprep.mubr.bf16.mxu0 %v911_v20  ;;  %vm751_vm12 = vcmp.ge.f32.partialorder %v650_v6, 0.0  ;;  %v819_v33 = vmul.f32 0.2, %v650_v6  ;;  %2647 = vmatpush3.bf16.msra.mxu0 %v3414_v30  ;;  %v4168_v59 = vpack.c.bf16 %v3350_v50, %v3342_v48  ;;  %v3470_v48 = vld [vmem:[%s4116_s2 + $0x1d8] sm:$0xff]  }
 0x152   :  { %v3438_v1 = vsel %vm753_vm11, %v2773_v41, %v821_v7  ;;  %2521 = vmatpush3.bf16.msra.mxu1 %v2872_v63  ;;  %v915_v23 = vpack.c.bf16 %v886_v45, %v885_v62  ;;  %2648 = vmatprep.subr.bf16.mxu0 %v3422_v4  ;;  %v3462_v63 = vld [vmem:[%s4116_s2 + $0x190] sm:$0xff]  }
 0x153   :  { %v887_v20 = vsel %vm751_vm12, %v650_v6, %v819_v33  ;;  %2522 = vmatprep.subr.bf16.mxu1 %v2873_v51  ;;  %v2876_v51 = vld [vmem:[%s4116_s2 + $0x98] sm:$0xff]   ;;  %v2877_v6 = vld [vmem:[%s4116_s2 + $0xe0] sm:$0xff]   ;;  %v4169_v33 = vpack.c.bf16 %v3344_v9, %v3350_v50  ;;  %v4172_v36 = vpack.c.bf16 %v3438_v1, %v3427_v42 }
 0x154   :  { %v919_v62 = vpack.c.bf16 %v887_v20, %v886_v45  ;;  %v923_v61 = vpack.c.bf16 %v3427_v42, %v887_v20 }
 0x155   :  { %v2776_v12 = vpop.f32.mrb[60].mxu0  ;;  %1515 = vmatmul.mubr.bf16.gmra.mrb[4].mxu1 %v4168_v59  ;;  %2649 = vmatpush3.bf16.msra.mxu0 %v3436_v60  ;;  %v3487_v59 = vld [vmem:[%s4116_s2 + $0x198] sm:$0xff]  }
 0x156   :  { %vm756_vm13 = vcmp.ge.f32.partialorder %v2776_v12, 0.0  ;;  %v824_v35 = vmul.f32 0.2, %v2776_v12  ;;  %v663_v41 = vpop.f32.mrb[61].mxu0  ;;  %1522 = vmatprep.mubr.bf16.mxu1 %v915_v23  ;;  %2523 = vmatpush3.bf16.msra.mxu1 %v2874_v57 }
 0x157   :  { %vm754_vm14 = vcmp.ge.f32.partialorder %v663_v41, 0.0  ;;  %v822_v52 = vmul.f32 0.2, %v663_v41  ;;  %v2777_v7 = vpop.f32.mrb[62].mxu0  ;;  %2524 = vmatprep.subr.bf16.mxu1 %v2875_v5  ;;  %2650 = vmatprep.subr.bf16.mxu0 %v3452_v25 }
 0x158   :  { %v3476_v45 = vsel %vm756_vm13, %v2776_v12, %v824_v35  ;;  %1709 = vmatmul.mubr.bf16.gmra.mrb[72].mxu0 %v4169_v33  ;;  %vm757_vm15 = vcmp.ge.f32.partialorder %v2777_v7, 0.0  ;;  %v825_v23 = vmul.f32 0.2, %v2777_v7  ;;  %v666_v57 = vpop.f32.mrb[63].mxu0  ;;  %v2878_v35 = vld [vmem:[%s4116_s2 + $0xa0] sm:$0xff]  }
 0x159   :  { %v3481_v20 = vsel %vm754_vm14, %v663_v41, %v822_v52  ;;  %1716 = vmatprep.mubr.bf16.mxu0 %v919_v62  ;;  %vm755_vm0 = vcmp.ge.f32.partialorder %v666_v57, 0.0  ;;  %v823_v5 = vmul.f32 0.2, %v666_v57  ;;  %2651 = vmatpush3.bf16.msra.mxu0 %v3462_v63  ;;  %v2882_v52 = vld [vmem:[%s4116_s2 + $0xe8] sm:$0xff]  }
 0x15a   :  { %v3489_v12 = vsel %vm757_vm15, %v2777_v7, %v825_v23  ;;  %2525 = vmatpush3.bf16.msra.mxu1 %v2876_v51  ;;  %v931_v50 = vpack.c.bf16 %v3481_v20, %v3438_v1  ;;  %2652 = vmatprep.subr.bf16.mxu0 %v3470_v48  ;;  %v3507_v51 = vld [vmem:[%s4116_s2 + $0x1e0] sm:$0xff]   ;;  %v2894_v1 = vld [vmem:[%s4116_s2 + $0xf8] sm:$0xff]  }
 0x15b   :  { %v3497_v62 = vsel %vm755_vm0, %v666_v57, %v823_v5  ;;  %2526 = vmatprep.subr.bf16.mxu1 %v2877_v6  ;;  %v4170_v6 = vpack.c.bf16 %v3348_v2, %v3344_v9  ;;  %v3520_v57 = vld [vmem:[%s4116_s2 + $0x1a0] sm:$0xff]   ;;  %v3528_v9 = vld [vmem:[%s4116_s2 + $0x1e8] sm:$0xff]  }
 0x15c   :  { %v935_v7 = vpack.c.bf16 %v3497_v62, %v3481_v20  ;;  %v2884_v20 = vld [vmem:[%s4116_s2 + $0xa8] sm:$0xff]  }
 0x15d   :  { %1523 = vmatmul.mubr.bf16.gmra.mrb[8].mxu1 %v4170_v6  ;;  %v2780_v23 = vpop.f32.mrb[64].mxu0  ;;  %2653 = vmatpush3.bf16.msra.mxu0 %v3487_v59 }
 0x15e   :  { %1530 = vmatprep.mubr.bf16.mxu1 %v923_v61  ;;  %vm760_vm1 = vcmp.ge.f32.partialorder %v2780_v23, 0.0  ;;  %v828_v5 = vmul.f32 0.2, %v2780_v23  ;;  %v679_v41 = vpop.f32.mrb[65].mxu0  ;;  %2527 = vmatpush3.bf16.msra.mxu1 %v2878_v35  ;;  %v2888_v61 = vld [vmem:[%s4116_s2 + $0xf0] sm:$0xff]   ;;  %v4171_v35 = vpack.c.bf16 %v3358_v8, %v3348_v2 }
 0x15f   :  { %vm758_vm2 = vcmp.ge.f32.partialorder %v679_v41, 0.0  ;;  %v826_v6 = vmul.f32 0.2, %v679_v41  ;;  %v2781_v33 = vpop.f32.mrb[66].mxu0  ;;  %2528 = vmatprep.subr.bf16.mxu1 %v2882_v52  ;;  %2654 = vmatprep.subr.bf16.mxu0 %v3507_v51 }
 0x160   :  { %1717 = vmatmul.mubr.bf16.gmra.mrb[76].mxu0 %v4171_v35  ;;  %v896_v18 = vsel %vm760_vm1, %v2780_v23, %v828_v5  ;;  %vm761_vm3 = vcmp.ge.f32.partialorder %v2781_v33, 0.0  ;;  %v829_v46 = vmul.f32 0.2, %v2781_v33  ;;  %v682_v47 = vpop.f32.mrb[67].mxu0  ;;  %v2890_v5 = vld [vmem:[%s4116_s2 + $0xb0] sm:$0xff]   ;;  %v4175_v35 = vpack.c.bf16 %v3362_v34, %v3360_v37 }
 0x161   :  { %1724 = vmatprep.mubr.bf16.mxu0 %v4172_v36  ;;  %v894_v10 = vsel %vm758_vm2, %v679_v41, %v826_v6  ;;  %vm759_vm4 = vcmp.ge.f32.partialorder %v682_v47, 0.0  ;;  %v827_v52 = vmul.f32 0.2, %v682_v47  ;;  %2655 = vmatpush3.bf16.msra.mxu0 %v3520_v57  ;;  %v2896_v6 = vld [vmem:[%s4116_s2 + $0xb8] sm:$0xff]  }
 0x162   :  { %v897_v2 = vsel %vm761_vm3, %v2781_v33, %v829_v46  ;;  %2529 = vmatpush3.bf16.msra.mxu1 %v2884_v20  ;;  %v947_v23 = vpack.c.bf16 %v894_v10, %v3489_v12  ;;  %2656 = vmatprep.subr.bf16.mxu0 %v3528_v9  ;;  %v3557_v46 = vld [vmem:[%s4116_s2 + $0x1f0] sm:$0xff]   ;;  %v4173_v20 = vpack.c.bf16 %v3366_v17, %v3358_v8 }
 0x163   :  { %v895_v36 = vsel %vm759_vm4, %v682_v47, %v827_v52  ;;  %2530 = vmatprep.subr.bf16.mxu1 %v2888_v61  ;;  %v959_v42 = vpack.c.bf16 %v897_v2, %v896_v18  ;;  %v3566_v47 = vld [vmem:[%s4116_s2 + $0x1b0] sm:$0xff]   ;;  %v4174_v8 = vpack.c.bf16 %v3360_v37, %v3366_v17  ;;  %v2900_v61 = vld [vmem:[%s4116_s2 + $0x1b8] sm:$0xff]   ;;  %v1863_v17 = vld [vmem:[%s4117_s7 + $0x8] sm:$0xff]  ;;  %v4177_v52 = vpack.c.bf16 %v3374_v40, %v3362_v34 }
 0x164   :  { %v951_v41 = vpack.c.bf16 %v895_v36, %v894_v10  ;;  %v955_v33 = vpack.c.bf16 %v896_v18, %v895_v36  ;;  %v2899_v10 = vld [vmem:[%s4116_s2 + $0x1f8] sm:$0xff]   ;;  %v2911_v18 = vmov 0   ;;  %v4179_v2 = vpack.c.bf16 %v3382_v55, %v3374_v40  ;;  %v1864_v34 = vld [vmem:[%s4117_s7 + $0x10] sm:$0xff]  ;;  %v1874_v36 = vld [vmem:[%s4117_s7 + $0x60] sm:$0xff] }
 0x165   :  { %1531 = vmatmul.mubr.bf16.gmra.mrb[12].mxu1 %v4173_v20  ;;  %2657 = vmatpush3.bf16.msra.mxu0 %v3544_v44  ;;  %v4180_v37 = vpack.c.bf16 %v3376_v26, %v3382_v55  ;;  %v4182_v40 = vpack.c.bf16 %v3390_v3, %v3378_v19  ;;  %v4183_v55 = vpack.c.bf16 %v3396_v0, %v3390_v3 }
 0x166   :  { %1538 = vmatprep.mubr.bf16.mxu1 %v931_v50  ;;  %2531 = vmatpush3.bf16.msra.mxu1 %v2890_v5  ;;  %v1862_v50 = vld [vmem:[%s4117_s7] sm:$0xff]  ;;  %v4188_v3 = vpack.c.bf16 %v3280_v43, %v3270_v22  ;;  %v1873_v5 = vld [vmem:[%s4117_s7 + $0x58] sm:$0xff] }
 0x167   :  { %2532 = vmatprep.subr.bf16.mxu1 %v2894_v1  ;;  %2658 = vmatprep.subr.bf16.mxu0 %v3557_v46  ;;  %v4202_v1 = vld [vmem:[#allocation4_spill] sm:$0xff] }
 0x168   :  { %1725 = vmatmul.mubr.bf16.gmra.mrb[80].mxu0 %v4174_v8  ;;  %2799 = vset.pattern.permute.xlu0 %v2911_v18  ;;  %v4207_v8 = vld [vmem:[#allocation9_spill] sm:$0xff] }
 0x169   :  { %1732 = vmatprep.mubr.bf16.mxu0 %v935_v7  ;;  %2659 = vmatpush3.bf16.msra.mxu0 %v3566_v47  ;;  %v4176_v7 = vpack.c.bf16 %v3476_v45, %v3497_v62  ;;  %v4181_v62 = vpack.c.bf16 %v3378_v19, %v3376_v26  ;;  %v4185_v26 = vpack.c.bf16 %v3394_v58, %v3396_v0 }
 0x16a   :  { %2533 = vmatpush3.bf16.msra.mxu1 %v2896_v6  ;;  %2660 = vmatprep.subr.bf16.mxu0 %v2899_v10  ;;  %v4187_v19 = vpack.c.bf16 %v3204_v16, %v3202_v15  ;;  %v4189_v0 = vpack.c.bf16 %v3198_v13, %v3204_v16  ;;  %v4190_v15 = vpack.c.bf16 %v3200_v14, %v3198_v13  ;;  %v1876_v6 = vld [vmem:[%s4117_s7 + $0x70] sm:$0xff] }
 0x16b   :  { %2782 = vmatprep.subr.bf16.mxu1 %v3231_v39  ;;  %1880 = vperm.xlu0 %2799, %v1862_v50   ;;  %v4178_v39 = vpack.c.bf16 %v3489_v12, %v3476_v45  ;;  %v4184_v45 = vpack.c.bf16 %v3268_v21, %v3274_v24  ;;  %v4186_v12 = vpack.c.bf16 %v3270_v22, %v3268_v21  ;;  %v1865_v22 = vld [vmem:[%s4117_s7 + $0x18] sm:$0xff]  ;;  %v1866_v24 = vld [vmem:[%s4117_s7 + $0x20] sm:$0xff] }
 0x16c   :  { %2800 = vset.pattern.permute.xlu1 %v2911_v18  ;;  %v4191_v21 = vpack.c.bf16 %v3282_v53, %v3288_v56  ;;  %v4192_v16 = vpack.c.bf16 %v3220_v32, %v3212_v27  ;;  %v4193_v13 = vpack.c.bf16 %v3296_v11, %v3284_v54  ;;  %v4194_v58 = vpack.c.bf16 %v3218_v31, %v3214_v29  ;;  %v4208_v18 = vld [vmem:[#allocation6_spill] sm:$0xff] }
 0x16d   :  { %1539 = vmatmul.mubr.bf16.gmra.mrb[16].mxu1 %v4175_v35  ;;  %2661 = vmatpush3.bf16.msra.mxu0 %v2900_v61  ;;  %v4209_v50 = vpack.c.bf16 %v4207_v8, %v4208_v18 }
 0x16e   :  { %1546 = vmatprep.mubr.bf16.mxu1 %v4176_v7  ;;  %1890 = vperm.xlu1 %2800, %v1864_v34   ;;  %v4213_v7 = vld [vmem:[#allocation8_spill] sm:$0xff]  ;;  %v4219_v34 = vpack.c.bf16 %v3214_v29, %v3220_v32 }
 0x16f   :  { %1885 = vperm.xlu0 %2799, %v1863_v17   ;;  %v4211_v17 = vld [vmem:[#allocation14_spill] sm:$0xff] }
 0x170   :  { %1733 = vmatmul.mubr.bf16.gmra.mrb[84].mxu0 %v4177_v52  ;;  %v4214_v52 = vld [vmem:[#allocation7_spill] sm:$0xff] }
 0x171   :  { %1740 = vmatprep.mubr.bf16.mxu0 %v4178_v39  ;;  %v4215_v39 = vpack.c.bf16 %v4213_v7, %v4214_v52 }
 0x172   :  { %1895 = vperm.xlu1 %2800, %v1865_v22  }
 0x173   :  { %1900 = vperm.xlu0 %2799, %v1866_v24  }
 0x175   :  { %1547 = vmatmul.mubr.bf16.gmra.mrb[20].mxu1 %v4179_v2  ;;  %v4216_v2 = vpack.c.bf16 %v3288_v56, %v3280_v43  ;;  %v4230_v56 = vld [vmem:[#allocation10_spill] sm:$0xff] }
 0x176   :  { %1554 = vmatprep.mubr.bf16.mxu1 %v947_v23  ;;  %v1872_v23 = vld [vmem:[%s4117_s7 + $0x50] sm:$0xff] }
 0x178   :  { %1741 = vmatmul.mubr.bf16.gmra.mrb[88].mxu0 %v4180_v37  ;;  %v4217_v37 = vpack.c.bf16 %v3212_v27, %v3200_v14  ;;  %v4223_v27 = vpack.c.bf16 %v4202_v1, %v3242_v49 }
 0x179   :  { %1748 = vmatprep.mubr.bf16.mxu0 %v951_v41  ;;  %v4204_v41 = vld [vmem:[#allocation13_spill] sm:$0xff] }
 0x17d   :  { %1555 = vmatmul.mubr.bf16.gmra.mrb[24].mxu1 %v4181_v62  ;;  %v4218_v62 = vpack.c.bf16 %v3284_v54, %v3282_v53  ;;  %v4227_v53 = vpack.c.bf16 %v4214_v52, %v4207_v8  ;;  %v4228_v54 = vld [vmem:[#allocation17_spill] sm:$0xff] }
 0x17e   :  { %1562 = vmatprep.mubr.bf16.mxu1 %v955_v33  ;;  %v4205_v33 = vld [vmem:[#allocation15_spill] sm:$0xff] }
 0x17f   :  { %v4206_v20 = vpack.c.bf16 %v4204_v41, %v4205_v33 }
 0x180   :  { %1749 = vmatmul.mubr.bf16.gmra.mrb[92].mxu0 %v4182_v40  ;;  %v4220_v40 = vpack.c.bf16 %v3304_v38, %v3296_v11  ;;  %v4231_v11 = vpack.c.bf16 %v4230_v56, %v4213_v7 }
 0x181   :  { %1756 = vmatprep.mubr.bf16.mxu0 %v959_v42  ;;  %v4201_v42 = vld [vmem:[#allocation5_spill] sm:$0xff] }
 0x182   :  { %v4225_v32 = vpack.c.bf16 %v4208_v18, %v4201_v42 }
 0x185   :  { %1563 = vmatmul.mubr.bf16.gmra.mrb[28].mxu1 %v4183_v55 }
 0x186   :  { %1603 = vmatprep.mubr.bf16.mxu1 %v4184_v45 }
 0x188   :  { %1757 = vmatmul.mubr.bf16.gmra.mrb[96].mxu0 %v4185_v26 }
 0x189   :  { %1797 = vmatprep.mubr.bf16.mxu0 %v4186_v12 }
 0x18d   :  { %1604 = vmatmul.mubr.bf16.vlgmr.msra.gmra.mrb[32].mxu1 %v4187_v19 }
 0x18e   :  { %2790 = vmatpush3.bf16.msra.mxu1 %v3414_v30  ;;  %1611 = vmatprep.mubr.bf16.mxu1 %v4188_v3  ;;  %v4195_v30 = vpack.c.bf16 %v3298_v28, %v3304_v38 }
 0x18f   :  { %2783 = vmatprep.subr.bf16.mxu1 %v3422_v4  ;;  %v1868_v4 = vld [vmem:[%s4117_s7 + $0x30] sm:$0xff] }
 0x190   :  { %1798 = vmatmul.mubr.bf16.vlgmr.msra.gmra.mrb[100].mxu0 %v4189_v0  ;;  %1910 = vperm.xlu0 %2799, %v1868_v4  }
 0x192   :  { %2791 = vmatpush3.bf16.msra.mxu1 %v3436_v60  ;;  %v1869_v60 = vld [vmem:[%s4117_s7 + $0x38] sm:$0xff] }
 0x193   :  { %2784 = vmatprep.subr.bf16.mxu1 %v3452_v25  ;;  %v1870_v25 = vld [vmem:[%s4117_s7 + $0x40] sm:$0xff] }
 0x194   :  { %1920 = vperm.xlu0 %2799, %v1870_v25  }
 0x195   :  { %1612 = vmatmul.mubr.bf16.gmra.mrb[36].mxu1 %v4190_v15 }
 0x196   :  { %1619 = vmatprep.mubr.bf16.mxu1 %v4191_v21  ;;  %2792 = vmatpush3.bf16.msra.mxu1 %v3462_v63  ;;  %v4196_v63 = vld [vmem:[#allocation3_spill] sm:$0xff] }
 0x197   :  { %2785 = vmatprep.subr.bf16.mxu1 %v3470_v48  ;;  %v4197_v48 = vpack.c.bf16 %v3242_v49, %v4196_v63  ;;  %v4221_v43 = vpack.c.bf16 %v4196_v63, %v3218_v31  ;;  %v4226_v31 = vpack.c.bf16 %v4211_v17, %v4204_v41 }
 0x198   :  { %1930 = vperm.xlu0 %2799, %v1872_v23  }
 0x19a   :  { %2793 = vmatpush3.bf16.msra.mxu1 %v3487_v59  ;;  %v4198_v59 = vld [vmem:[#allocation12_spill] sm:$0xff] }
 0x19b   :  { %2786 = vmatprep.subr.bf16.mxu1 %v3507_v51  ;;  %v4199_v51 = vld [vmem:[#allocation11_spill] sm:$0xff]  ;;  %v4224_v29 = vpack.c.bf16 %v4205_v33, %v4198_v59 }
 0x19c   :  { %1940 = vperm.xlu0 %2799, %v1874_v36   ;;  %v4222_v14 = vpack.c.bf16 %v4199_v51, %v3298_v28 }
 0x19d   :  { %1620 = vmatmul.mubr.bf16.gmra.mrb[40].mxu1 %v4192_v16 }
 0x19e   :  { %1627 = vmatprep.mubr.bf16.mxu1 %v4193_v13  ;;  %2794 = vmatpush3.bf16.msra.mxu1 %v3520_v57  ;;  %v4200_v57 = vpack.c.bf16 %v4198_v59, %v4199_v51 }
 0x19f   :  { %2787 = vmatprep.subr.bf16.mxu1 %v3528_v9  ;;  %v1871_v9 = vld [vmem:[%s4117_s7 + $0x48] sm:$0xff] }
 0x1a0   :  { %1950 = vperm.xlu0 %2799, %v1876_v6  }
 0x1a2   :  { %2795 = vmatpush3.bf16.msra.mxu1 %v3544_v44  ;;  %v1867_v44 = vld [vmem:[%s4117_s7 + $0x28] sm:$0xff] }
 0x1a3   :  { %2788 = vmatprep.subr.bf16.mxu1 %v3557_v46  ;;  %1905 = vperm.xlu1 %2800, %v1867_v44   ;;  %v4203_v46 = vpack.c.bf16 %v4201_v42, %v4202_v1 }
 0x1a5   :  { %1628 = vmatmul.mubr.bf16.gmra.mrb[44].mxu1 %v4194_v58 }
 0x1a6   :  { %1635 = vmatprep.mubr.bf16.mxu1 %v4195_v30  ;;  %2796 = vmatpush3.bf16.msra.mxu1 %v3566_v47  ;;  %v1875_v47 = vld [vmem:[%s4117_s7 + $0x68] sm:$0xff] }
 0x1a7   :  { %2789 = vmatprep.subr.bf16.mxu1 %v2899_v10  ;;  %1915 = vperm.xlu1 %2800, %v1869_v60   ;;  %v1877_v10 = vld [vmem:[%s4117_s7 + $0x78] sm:$0xff] }
 0x1aa   :  { %2797 = vmatpush3.bf16.msra.mxu1 %v2900_v61  ;;  %v4210_v61 = vld [vmem:[#allocation16_spill] sm:$0xff] }
 0x1ab   :  { %1925 = vperm.xlu1 %2800, %v1871_v9   ;;  %v4212_v35 = vpack.c.bf16 %v4210_v61, %v4211_v17  ;;  %v4229_v49 = vpack.c.bf16 %v4228_v54, %v4210_v61 }
 0x1ad   :  { %1636 = vmatmul.mubr.bf16.gmra.mrb[48].mxu1 %v4197_v48 }
 0x1ae   :  { %1643 = vmatprep.mubr.bf16.mxu1 %v4200_v57 }
 0x1af   :  { %1935 = vperm.xlu1 %2800, %v1873_v5  }
 0x1b3   :  { %1945 = vperm.xlu1 %2800, %v1875_v47  }
 0x1b5   :  { %1644 = vmatmul.mubr.bf16.gmra.mrb[52].mxu1 %v4203_v46 }
 0x1b6   :  { %1651 = vmatprep.mubr.bf16.mxu1 %v4206_v20 }
 0x1b7   :  { %1955 = vperm.xlu1 %2800, %v1877_v10  }
 0x1bd   :  { %1652 = vmatmul.mubr.bf16.gmra.mrb[56].mxu1 %v4209_v50 }
 0x1be   :  { %1659 = vmatprep.mubr.bf16.mxu1 %v4212_v35 }
 0x1c5   :  { %1660 = vmatmul.mubr.bf16.gmra.mrb[60].mxu1 %v4215_v39 }
 0x1c6   :  { %1805 = vmatprep.mubr.bf16.mxu1 %v4216_v2 }
 0x1cd   :  { %1806 = vmatmul.mubr.bf16.vlgmr.msra.gmra.mrb[64].mxu1 %v4217_v37 }
 0x1ce   :  { %1813 = vmatprep.mubr.bf16.mxu1 %v4218_v62 }
 0x1d5   :  { %1814 = vmatmul.mubr.bf16.gmra.mrb[68].mxu1 %v4219_v34 }
 0x1d6   :  { %1821 = vmatprep.mubr.bf16.mxu1 %v4220_v40 }
 0x1dd   :  { %1822 = vmatmul.mubr.bf16.gmra.mrb[72].mxu1 %v4221_v43 }
 0x1de   :  { %1829 = vmatprep.mubr.bf16.mxu1 %v4222_v14 }
 0x1e5   :  { %1830 = vmatmul.mubr.bf16.gmra.mrb[76].mxu1 %v4223_v27 }
 0x1e6   :  { %1837 = vmatprep.mubr.bf16.mxu1 %v4224_v29 }
 0x1ed   :  { %1838 = vmatmul.mubr.bf16.gmra.mrb[80].mxu1 %v4225_v32 }
 0x1ee   :  { %1845 = vmatprep.mubr.bf16.mxu1 %v4226_v31 }
 0x1f5   :  { %1846 = vmatmul.mubr.bf16.gmra.mrb[84].mxu1 %v4227_v53 }
 0x1f6   :  { %1853 = vmatprep.mubr.bf16.mxu1 %v4229_v49 }
 0x1fd   :  { %1854 = vmatmul.mubr.bf16.gmra.mrb[88].mxu1 %v4231_v11 }
 0x220   :  { %v2470_v28 = vpop.f32.mrb[0].mxu1 }
 0x221   :  { %v2471_v38 = vpop.f32.mrb[1].mxu1 }
 0x222   :  { %v3770_v55 = vadd.f32 %v2471_v38, %v2470_v28  ;;  %v2473_v45 = vpop.f32.mrb[2].mxu1 }
 0x223   :  { %v2598_v26 = vpop.f32.mrb[68].mxu0  ;;  %v2474_v12 = vpop.f32.mrb[3].mxu1 }
 0x224   :  { %v3772_v19 = vadd.f32 %v2474_v12, %v2473_v45  ;;  %v2599_v3 = vpop.f32.mrb[69].mxu0 }
 0x225   :  { %v3774_v0 = vadd.f32 %v2599_v3, %v2598_v26  ;;  %v2601_v15 = vpop.f32.mrb[70].mxu0 }
 0x226   :  { %v2602_v21 = vpop.f32.mrb[71].mxu0 }
 0x227   :  { %v3776_v16 = vadd.f32 %v2602_v21, %v2601_v15 }
 0x228   :  { %v2476_v13 = vpop.f32.mrb[4].mxu1 }
 0x229   :  { %v2477_v22 = vpop.f32.mrb[5].mxu1 }
 0x22a   :  { %v3778_v24 = vadd.f32 %v2477_v22, %v2476_v13  ;;  %v2479_v58 = vpop.f32.mrb[6].mxu1 }
 0x22b   :  { %v2604_v30 = vpop.f32.mrb[72].mxu0  ;;  %v2480_v44 = vpop.f32.mrb[7].mxu1 }
 0x22c   :  { %v3780_v4 = vadd.f32 %v2480_v44, %v2479_v58  ;;  %v2605_v60 = vpop.f32.mrb[73].mxu0 }
 0x22d   :  { %v3782_v25 = vadd.f32 %v2605_v60, %v2604_v30  ;;  %v2607_v63 = vpop.f32.mrb[74].mxu0 }
 0x22e   :  { %v2608_v48 = vpop.f32.mrb[75].mxu0 }
 0x22f   :  { %v3784_v59 = vadd.f32 %v2608_v48, %v2607_v63 }
 0x230   :  { %v2482_v51 = vpop.f32.mrb[8].mxu1 }
 0x231   :  { %v2483_v57 = vpop.f32.mrb[9].mxu1 }
 0x232   :  { %v3786_v9 = vadd.f32 %v2483_v57, %v2482_v51  ;;  %v2485_v23 = vpop.f32.mrb[10].mxu1 }
 0x233   :  { %v2610_v5 = vpop.f32.mrb[76].mxu0  ;;  %v2486_v36 = vpop.f32.mrb[11].mxu1 }
 0x234   :  { %v3788_v42 = vadd.f32 %v2486_v36, %v2485_v23  ;;  %v2611_v1 = vpop.f32.mrb[77].mxu0 }
 0x235   :  { %v3790_v46 = vadd.f32 %v2611_v1, %v2610_v5  ;;  %v2613_v41 = vpop.f32.mrb[78].mxu0 }
 0x236   :  { %v2614_v33 = vpop.f32.mrb[79].mxu0 }
 0x237   :  { %v3792_v20 = vadd.f32 %v2614_v33, %v2613_v41 }
 0x238   :  { %v2488_v47 = vpop.f32.mrb[12].mxu1 }
 0x239   :  { %v2489_v6 = vpop.f32.mrb[13].mxu1 }
 0x23a   :  { %v3794_v10 = vadd.f32 %v2489_v6, %v2488_v47  ;;  %v2491_v8 = vpop.f32.mrb[14].mxu1 }
 0x23b   :  { %v2616_v18 = vpop.f32.mrb[80].mxu0  ;;  %v2492_v50 = vpop.f32.mrb[15].mxu1 }
 0x23c   :  { %v3796_v61 = vadd.f32 %v2492_v50, %v2491_v8  ;;  %v2617_v17 = vpop.f32.mrb[81].mxu0 }
 0x23d   :  { %v3798_v35 = vadd.f32 %v2617_v17, %v2616_v18  ;;  %v2619_v7 = vpop.f32.mrb[82].mxu0 }
 0x23e   :  { %v2620_v52 = vpop.f32.mrb[83].mxu0 }
 0x23f   :  { %v3800_v39 = vadd.f32 %v2620_v52, %v2619_v7 }
 0x240   :  { %v2494_v2 = vpop.f32.mrb[16].mxu1 }
 0x241   :  { %v2495_v37 = vpop.f32.mrb[17].mxu1 }
 0x242   :  { %v3802_v62 = vadd.f32 %v2495_v37, %v2494_v2  ;;  %v2497_v34 = vpop.f32.mrb[18].mxu1 }
 0x243   :  { %v2622_v40 = vpop.f32.mrb[84].mxu0  ;;  %v2498_v43 = vpop.f32.mrb[19].mxu1 }
 0x244   :  { %v3804_v14 = vadd.f32 %v2498_v43, %v2497_v34  ;;  %v2623_v27 = vpop.f32.mrb[85].mxu0 }
 0x245   :  { %v3806_v29 = vadd.f32 %v2623_v27, %v2622_v40  ;;  %v2625_v32 = vpop.f32.mrb[86].mxu0 }
 0x246   :  { %v2626_v31 = vpop.f32.mrb[87].mxu0 }
 0x247   :  { %v3808_v53 = vadd.f32 %v2626_v31, %v2625_v32 }
 0x248   :  { %v2500_v54 = vpop.f32.mrb[20].mxu1 }
 0x249   :  { %v2501_v49 = vpop.f32.mrb[21].mxu1 }
 0x24a   :  { %v3810_v56 = vadd.f32 %v2501_v49, %v2500_v54  ;;  %v2503_v11 = vpop.f32.mrb[22].mxu1 }
 0x24b   :  { %v2628_v28 = vpop.f32.mrb[88].mxu0  ;;  %v2504_v38 = vpop.f32.mrb[23].mxu1 }
 0x24c   :  { %v3812_v45 = vadd.f32 %v2504_v38, %v2503_v11  ;;  %v2629_v26 = vpop.f32.mrb[89].mxu0 }
 0x24d   :  { %v3814_v12 = vadd.f32 %v2629_v26, %v2628_v28  ;;  %v2631_v3 = vpop.f32.mrb[90].mxu0 }
 0x24e   :  { %v2632_v15 = vpop.f32.mrb[91].mxu0 }
 0x24f   :  { %v3816_v21 = vadd.f32 %v2632_v15, %v2631_v3 }
 0x250   :  { %v2506_v13 = vpop.f32.mrb[24].mxu1 }
 0x251   :  { %v2507_v22 = vpop.f32.mrb[25].mxu1 }
 0x252   :  { %v3818_v58 = vadd.f32 %v2507_v22, %v2506_v13  ;;  %v2509_v30 = vpop.f32.mrb[26].mxu1 }
 0x253   :  { %v2634_v44 = vpop.f32.mrb[92].mxu0  ;;  %v2510_v60 = vpop.f32.mrb[27].mxu1 }
 0x254   :  { %v3820_v63 = vadd.f32 %v2510_v60, %v2509_v30  ;;  %v2635_v48 = vpop.f32.mrb[93].mxu0 }
 0x255   :  { %v3822_v51 = vadd.f32 %v2635_v48, %v2634_v44  ;;  %v2637_v57 = vpop.f32.mrb[94].mxu0 }
 0x256   :  { %v2638_v23 = vpop.f32.mrb[95].mxu0 }
 0x257   :  { %v3824_v5 = vadd.f32 %v2638_v23, %v2637_v57 }
 0x258   :  { %v2512_v36 = vpop.f32.mrb[28].mxu1 }
 0x259   :  { %v2513_v1 = vpop.f32.mrb[29].mxu1 }
 0x25a   :  { %v3826_v41 = vadd.f32 %v2513_v1, %v2512_v36  ;;  %v2515_v33 = vpop.f32.mrb[30].mxu1 }
 0x25b   :  { %v2640_v47 = vpop.f32.mrb[96].mxu0  ;;  %v2516_v6 = vpop.f32.mrb[31].mxu1 }
 0x25c   :  { %v3828_v8 = vadd.f32 %v2516_v6, %v2515_v33  ;;  %v2641_v18 = vpop.f32.mrb[97].mxu0 }
 0x25d   :  { %v3830_v50 = vadd.f32 %v2641_v18, %v2640_v47  ;;  %v2643_v17 = vpop.f32.mrb[98].mxu0 }
 0x25e   :  { %v2644_v7 = vpop.f32.mrb[99].mxu0 }
 0x25f   :  { %v3832_v52 = vadd.f32 %v2644_v7, %v2643_v17 }
 0x260   :  { %v2534_v2 = vpop.f32.mrb[32].mxu1 }
 0x261   :  { %v2535_v37 = vpop.f32.mrb[33].mxu1 }
 0x262   :  { %v2536_v34 = vadd.f32 %v2535_v37, %v2534_v2  ;;  %v2537_v40 = vpop.f32.mrb[34].mxu1 }
 0x263   :  { %v2662_v43 = vpop.f32.mrb[100].mxu0  ;;  %v2538_v27 = vpop.f32.mrb[35].mxu1 }
 0x264   :  { %v1606_v32 = vadd.f32 %v2536_v34, %v3770_v55  ;;  %v2539_v31 = vadd.f32 %v2538_v27, %v2537_v40  ;;  %v2663_v54 = vpop.f32.mrb[101].mxu0 }
 0x265   :  { %v2664_v49 = vadd.f32 %v2663_v54, %v2662_v43  ;;  %v2665_v11 = vpop.f32.mrb[102].mxu0 }
 0x266   :  { %v1609_v28 = vadd.f32 %v2539_v31, %v3772_v19  ;;  %v1703_v38 = vadd.f32 %v3774_v0, %v1606_v32  ;;  %v2666_v26 = vpop.f32.mrb[103].mxu0 }
 0x267   :  { %v2667_v3 = vadd.f32 %v2666_v26, %v2665_v11 }
 0x268   :  { %v3837_v15 = vadd.f32 %v2664_v49, %v1703_v38  ;;  %v1706_v13 = vadd.f32 %v3776_v16, %v1609_v28  ;;  %v2540_v22 = vpop.f32.mrb[36].mxu1 }
 0x269   :  { %v2541_v30 = vpop.f32.mrb[37].mxu1 }
 0x26a   :  { %v3840_v44 = vadd.f32 %v2667_v3, %v1706_v13  ;;  %v2542_v60 = vadd.f32 %v2541_v30, %v2540_v22  ;;  %v2543_v55 = vpop.f32.mrb[38].mxu1 }
 0x26b   :  { %v2544_v48 = vpop.f32.mrb[39].mxu1 }
 0x26c   :  { %v1614_v57 = vadd.f32 %v2542_v60, %v3778_v24  ;;  %v2545_v23 = vadd.f32 %v2544_v48, %v2543_v55 }
 0x26e   :  { %v1617_v19 = vadd.f32 %v2545_v23, %v3780_v4  ;;  %v3845_v0 = vadd.f32 %v3782_v25, %v1614_v57 }
 0x270   :  { %v2546_v36 = vpop.f32.mrb[40].mxu1  ;;  %v3848_v1 = vadd.f32 %v3784_v59, %v1617_v19 }
 0x271   :  { %v2547_v16 = vpop.f32.mrb[41].mxu1 }
 0x272   :  { %v2548_v33 = vadd.f32 %v2547_v16, %v2546_v36  ;;  %v2549_v47 = vpop.f32.mrb[42].mxu1  ;;  %v1881_v36 = vpop.permute.xlu0 %1880 }
 0x273   :  { %v2550_v6 = vpop.f32.mrb[43].mxu1 }
 0x274   :  { %v1622_v18 = vadd.f32 %v2548_v33, %v3786_v9  ;;  %v2551_v17 = vadd.f32 %v2550_v6, %v2549_v47 }
 0x276   :  { %v1625_v7 = vadd.f32 %v2551_v17, %v3788_v42  ;;  %v3853_v24 = vadd.f32 %v3790_v46, %v1622_v18 }
 0x278   :  { %v2552_v4 = vpop.f32.mrb[44].mxu1  ;;  %v3856_v25 = vadd.f32 %v3792_v20, %v1625_v7 }
 0x279   :  { %v2553_v2 = vpop.f32.mrb[45].mxu1 }
 0x27a   :  { %v2554_v37 = vadd.f32 %v2553_v2, %v2552_v4  ;;  %v2555_v59 = vpop.f32.mrb[46].mxu1 }
 0x27b   :  { %v2556_v34 = vpop.f32.mrb[47].mxu1 }
 0x27c   :  { %v1630_v40 = vadd.f32 %v2554_v37, %v3794_v10  ;;  %v2557_v43 = vadd.f32 %v2556_v34, %v2555_v59 }
 0x27e   :  { %v1633_v27 = vadd.f32 %v2557_v43, %v3796_v61  ;;  %v3861_v9 = vadd.f32 %v3798_v35, %v1630_v40 }
 0x280   :  { %v2558_v42 = vpop.f32.mrb[48].mxu1  ;;  %v3864_v46 = vadd.f32 %v3800_v39, %v1633_v27 }
 0x281   :  { %v2559_v32 = vpop.f32.mrb[49].mxu1 }
 0x282   :  { %v2560_v31 = vadd.f32 %v2559_v32, %v2558_v42  ;;  %v2561_v20 = vpop.f32.mrb[50].mxu1 }
 0x283   :  { %v2562_v54 = vpop.f32.mrb[51].mxu1 }
 0x284   :  { %v1638_v49 = vadd.f32 %v2560_v31, %v3802_v62  ;;  %v2563_v11 = vadd.f32 %v2562_v54, %v2561_v20 }
 0x286   :  { %v1641_v28 = vadd.f32 %v2563_v11, %v3804_v14  ;;  %v3869_v10 = vadd.f32 %v3806_v29, %v1638_v49 }
 0x288   :  { %v2564_v61 = vpop.f32.mrb[52].mxu1  ;;  %v3872_v35 = vadd.f32 %v3808_v53, %v1641_v28 }
 0x289   :  { %v2565_v38 = vpop.f32.mrb[53].mxu1 }
 0x28a   :  { %v2566_v26 = vadd.f32 %v2565_v38, %v2564_v61  ;;  %v2567_v39 = vpop.f32.mrb[54].mxu1 }
 0x28b   :  { %v2568_v3 = vpop.f32.mrb[55].mxu1 }
 0x28c   :  { %v1646_v13 = vadd.f32 %v2566_v26, %v3810_v56  ;;  %v2569_v22 = vadd.f32 %v2568_v3, %v2567_v39 }
 0x28e   :  { %v1649_v30 = vadd.f32 %v2569_v22, %v3812_v45  ;;  %v3877_v62 = vadd.f32 %v3814_v12, %v1646_v13 }
 0x290   :  { %v2570_v14 = vpop.f32.mrb[56].mxu1  ;;  %v3880_v29 = vadd.f32 %v3816_v21, %v1649_v30 }
 0x291   :  { %v2571_v60 = vpop.f32.mrb[57].mxu1 }
 0x292   :  { %v2572_v55 = vadd.f32 %v2571_v60, %v2570_v14  ;;  %v2573_v53 = vpop.f32.mrb[58].mxu1 }
 0x293   :  { %v2574_v48 = vpop.f32.mrb[59].mxu1 }
 0x294   :  { %v1654_v57 = vadd.f32 %v2572_v55, %v3818_v58  ;;  %v2575_v23 = vadd.f32 %v2574_v48, %v2573_v53 }
 0x296   :  { %v1657_v19 = vadd.f32 %v2575_v23, %v3820_v63  ;;  %v3885_v56 = vadd.f32 %v3822_v51, %v1654_v57  ;;  %v1886_v63 = vpop.permute.xlu0 %1885 }
 0x297   :  { %v1959_v2 = vmul.f32 %v1886_v63, %v3840_v44 }
 0x298   :  { %v2576_v45 = vpop.f32.mrb[60].mxu1  ;;  %v3888_v12 = vadd.f32 %v3824_v5, %v1657_v19  ;;  %v1891_v5 = vpop.permute.xlu1 %1890 }
 0x299   :  { %v2577_v16 = vpop.f32.mrb[61].mxu1 }
 0x29a   :  { %v2578_v21 = vadd.f32 %v2577_v16, %v2576_v45  ;;  %v2579_v33 = vpop.f32.mrb[62].mxu1  ;;  %v1901_v13 = vpop.permute.xlu0 %1900 }
 0x29b   :  { %v2580_v47 = vpop.f32.mrb[63].mxu1 }
 0x29c   :  { %v1662_v6 = vadd.f32 %v2578_v21, %v3826_v41  ;;  %v2581_v18 = vadd.f32 %v2580_v47, %v2579_v33  ;;  %v1958_v41 = vmul.f32 %v1881_v36, %v3837_v15  ;;  %v1896_v27 = vpop.permute.xlu1 %1895 }
 0x29e   :  { %v1665_v58 = vadd.f32 %v2581_v18, %v3828_v8  ;;  %v3893_v17 = vadd.f32 %v3830_v50, %v1662_v6  ;;  %v1997_v50 = vmul.f32 %v1959_v2, %v3840_v44  ;;  %v1996_v42 = vmul.f32 %v1958_v41, %v3837_v15  ;;  %v1911_v18 = vpop.permute.xlu0 %1910 }
 0x29f   :  { %v1974_v32 = vadd.f32 %v1959_v2, %v1958_v41 }
 0x2a0   :  { %v2668_v51 = vpop.f32.mrb[64].mxu1  ;;  %v3896_v7 = vadd.f32 %v3832_v52, %v1665_v58  ;;  %v1906_v60 = vpop.permute.xlu1 %1905 }
 0x2a1   :  { %v2669_v4 = vpop.f32.mrb[65].mxu1 }
 0x2a2   :  { %v2670_v37 = vadd.f32 %v2669_v4, %v2668_v51  ;;  %v2671_v59 = vpop.f32.mrb[66].mxu1 }
 0x2a3   :  { %v2672_v34 = vpop.f32.mrb[67].mxu1 }
 0x2a4   :  { %v3901_v40 = vadd.f32 %v2670_v37, %v3845_v0  ;;  %v2673_v8 = vadd.f32 %v2672_v34, %v2671_v59  ;;  %v2012_v0 = vadd.f32 %v1997_v50, %v1996_v42  ;;  %v1916_v51 = vpop.permute.xlu1 %1915 }
 0x2a6   :  { %v1960_v43 = vmul.f32 %v1891_v5, %v3901_v40  ;;  %v3906_v52 = vadd.f32 %v2673_v8, %v3848_v1 }
 0x2a8   :  { %v1998_v31 = vmul.f32 %v1960_v43, %v3901_v40  ;;  %v1961_v20 = vmul.f32 %v1896_v27, %v3906_v52  ;;  %v2674_v54 = vpop.f32.mrb[68].mxu1  ;;  %v1975_v11 = vadd.f32 %v1974_v32, %v1960_v43  ;;  %v1921_v32 = vpop.permute.xlu0 %1920 }
 0x2a9   :  { %v2675_v49 = vpop.f32.mrb[69].mxu1 }
 0x2aa   :  { %v2676_v28 = vadd.f32 %v2675_v49, %v2674_v54  ;;  %v2677_v61 = vpop.f32.mrb[70].mxu1  ;;  %v2013_v26 = vadd.f32 %v2012_v0, %v1998_v31  ;;  %v1999_v39 = vmul.f32 %v1961_v20, %v3906_v52  ;;  %v1976_v22 = vadd.f32 %v1975_v11, %v1961_v20  ;;  %v1926_v54 = vpop.permute.xlu1 %1925 }
 0x2ab   :  { %v2678_v38 = vpop.f32.mrb[71].mxu1 }
 0x2ac   :  { %v3913_v1 = vadd.f32 %v2676_v28, %v3853_v24  ;;  %v2679_v3 = vadd.f32 %v2678_v38, %v2677_v61  ;;  %v2014_v55 = vadd.f32 %v2013_v26, %v1999_v39 }
 0x2ae   :  { %v1962_v30 = vmul.f32 %v1901_v13, %v3913_v1  ;;  %v3917_v14 = vadd.f32 %v2679_v3, %v3856_v25 }
 0x2b0   :  { %v1977_v53 = vadd.f32 %v1976_v22, %v1962_v30  ;;  %v2000_v48 = vmul.f32 %v1962_v30, %v3913_v1  ;;  %v1963_v57 = vmul.f32 %v1906_v60, %v3917_v14  ;;  %v2680_v23 = vpop.f32.mrb[72].mxu1  ;;  %v1931_v60 = vpop.permute.xlu0 %1930 }
 0x2b1   :  { %v2681_v19 = vpop.f32.mrb[73].mxu1 }
 0x2b2   :  { %v2015_v45 = vadd.f32 %v2014_v55, %v2000_v48  ;;  %v1978_v24 = vadd.f32 %v1977_v53, %v1963_v57  ;;  %v2001_v36 = vmul.f32 %v1963_v57, %v3917_v14  ;;  %v2682_v16 = vadd.f32 %v2681_v19, %v2680_v23  ;;  %v2683_v21 = vpop.f32.mrb[74].mxu1  ;;  %v1936_v48 = vpop.permute.xlu1 %1935 }
 0x2b3   :  { %v2684_v33 = vpop.f32.mrb[75].mxu1 }
 0x2b4   :  { %v2016_v47 = vadd.f32 %v2015_v45, %v2001_v36  ;;  %v3923_v25 = vadd.f32 %v2682_v16, %v3861_v9  ;;  %v2685_v6 = vadd.f32 %v2684_v33, %v2683_v21 }
 0x2b6   :  { %v1964_v58 = vmul.f32 %v1911_v18, %v3923_v25  ;;  %v3927_v63 = vadd.f32 %v2685_v6, %v3864_v46 }
 0x2b8   :  { %v1979_v5 = vadd.f32 %v1978_v24, %v1964_v58  ;;  %v2002_v4 = vmul.f32 %v1964_v58, %v3923_v25  ;;  %v1965_v2 = vmul.f32 %v1916_v51, %v3927_v63  ;;  %v2686_v37 = vpop.f32.mrb[76].mxu1  ;;  %v1941_v58 = vpop.permute.xlu0 %1940 }
 0x2b9   :  { %v2687_v59 = vpop.f32.mrb[77].mxu1 }
 0x2ba   :  { %v2017_v34 = vadd.f32 %v2016_v47, %v2002_v4  ;;  %v1980_v41 = vadd.f32 %v1979_v5, %v1965_v2  ;;  %v2003_v9 = vmul.f32 %v1965_v2, %v3927_v63  ;;  %v2688_v8 = vadd.f32 %v2687_v59, %v2686_v37  ;;  %v2689_v50 = vpop.f32.mrb[78].mxu1  ;;  %v1946_v4 = vpop.permute.xlu1 %1945 }
 0x2bb   :  { %v2690_v43 = vpop.f32.mrb[79].mxu1 }
 0x2bc   :  { %v2018_v27 = vadd.f32 %v2017_v34, %v2003_v9  ;;  %v3933_v42 = vadd.f32 %v2688_v8, %v3869_v10  ;;  %v2691_v46 = vadd.f32 %v2690_v43, %v2689_v50 }
 0x2be   :  { %v1966_v31 = vmul.f32 %v1921_v32, %v3933_v42  ;;  %v3937_v20 = vadd.f32 %v2691_v46, %v3872_v35 }
 0x2c0   :  { %v1981_v49 = vadd.f32 %v1980_v41, %v1966_v31  ;;  %v2004_v0 = vmul.f32 %v1966_v31, %v3933_v42  ;;  %v1967_v11 = vmul.f32 %v1926_v54, %v3937_v20  ;;  %v2692_v28 = vpop.f32.mrb[80].mxu1  ;;  %v1951_v31 = vpop.permute.xlu0 %1950 }
 0x2c1   :  { %v2693_v61 = vpop.f32.mrb[81].mxu1 }
 0x2c2   :  { %v2019_v38 = vadd.f32 %v2018_v27, %v2004_v0  ;;  %v1982_v26 = vadd.f32 %v1981_v49, %v1967_v11  ;;  %v2005_v10 = vmul.f32 %v1967_v11, %v3937_v20  ;;  %v2694_v39 = vadd.f32 %v2693_v61, %v2692_v28  ;;  %v2695_v3 = vpop.f32.mrb[82].mxu1  ;;  %v1956_v0 = vpop.permute.xlu1 %1955 }
 0x2c3   :  { %v2696_v13 = vpop.f32.mrb[83].mxu1 }
 0x2c4   :  { %v2020_v22 = vadd.f32 %v2019_v38, %v2005_v10  ;;  %v3943_v30 = vadd.f32 %v2694_v39, %v3877_v62  ;;  %v2697_v35 = vadd.f32 %v2696_v13, %v2695_v3 }
 0x2c6   :  { %v1968_v55 = vmul.f32 %v1931_v60, %v3943_v30  ;;  %v3947_v53 = vadd.f32 %v2697_v35, %v3880_v29 }
 0x2c8   :  { %v1983_v57 = vadd.f32 %v1982_v26, %v1968_v55  ;;  %v2006_v23 = vmul.f32 %v1968_v55, %v3943_v30  ;;  %v1969_v19 = vmul.f32 %v1936_v48, %v3947_v53  ;;  %v2698_v45 = vpop.f32.mrb[84].mxu1 }
 0x2c9   :  { %v2699_v24 = vpop.f32.mrb[85].mxu1 }
 0x2ca   :  { %v2021_v36 = vadd.f32 %v2020_v22, %v2006_v23  ;;  %v1984_v16 = vadd.f32 %v1983_v57, %v1969_v19  ;;  %v2007_v62 = vmul.f32 %v1969_v19, %v3947_v53  ;;  %v2700_v21 = vadd.f32 %v2699_v24, %v2698_v45  ;;  %v2701_v33 = vpop.f32.mrb[86].mxu1 }
 0x2cb   :  { %v2702_v47 = vpop.f32.mrb[87].mxu1 }
 0x2cc   :  { %v2022_v6 = vadd.f32 %v2021_v36, %v2007_v62  ;;  %v3953_v18 = vadd.f32 %v2700_v21, %v3885_v56  ;;  %v2703_v29 = vadd.f32 %v2702_v47, %v2701_v33 }
 0x2ce   :  { %v1970_v51 = vmul.f32 %v1941_v58, %v3953_v18  ;;  %v3957_v5 = vadd.f32 %v2703_v29, %v3888_v12 }
 0x2d0   :  { %v1985_v2 = vadd.f32 %v1984_v16, %v1970_v51  ;;  %v2008_v37 = vmul.f32 %v1970_v51, %v3953_v18  ;;  %v1971_v59 = vmul.f32 %v1946_v4, %v3957_v5  ;;  %v2704_v34 = vpop.f32.mrb[88].mxu1 }
 0x2d1   :  { %v2705_v41 = vpop.f32.mrb[89].mxu1 }
 0x2d2   :  { %v2023_v9 = vadd.f32 %v2022_v6, %v2008_v37  ;;  %v1986_v8 = vadd.f32 %v1985_v2, %v1971_v59  ;;  %v2009_v56 = vmul.f32 %v1971_v59, %v3957_v5  ;;  %v2706_v50 = vadd.f32 %v2705_v41, %v2704_v34  ;;  %v2707_v43 = vpop.f32.mrb[90].mxu1  ;;  %v4000_v2 = vld [vmem:[%s4118_s3] ss:$0 sm:$0xff] }
 0x2d3   :  { %v2708_v27 = vpop.f32.mrb[91].mxu1 }
 0x2d4   :  { %v2024_v46 = vadd.f32 %v2023_v9, %v2009_v56  ;;  %v3963_v32 = vadd.f32 %v2706_v50, %v3893_v17  ;;  %v2709_v12 = vadd.f32 %v2708_v27, %v2707_v43  ;;  %v4017_v50 = vld [vmem:[%s4119_s4] ss:$0 sm:$0xff] }
 0x2d6   :  { %v1972_v54 = vmul.f32 %v1951_v31, %v3963_v32  ;;  %v1859_v49 = vadd.f32 %v2709_v12, %v3896_v7 }
 0x2d8   :  { %v1987_v11 = vadd.f32 %v1986_v8, %v1972_v54  ;;  %v2010_v28 = vmul.f32 %v1972_v54, %v3963_v32  ;;  %v1973_v61 = vmul.f32 %v1956_v0, %v1859_v49 }
 0x2da   :  { %v2025_v38 = vadd.f32 %v2024_v46, %v2010_v28  ;;  %v1988_v26 = vadd.f32 %v1987_v11, %v1973_v61  ;;  %v2011_v10 = vmul.f32 %v1973_v61, %v1859_v49 }
 0x2dc   :  { %v1989_v39 = vrot.slane %v1988_v26, 4  ;;  %v2026_v3 = vadd.f32 %v2025_v38, %v2011_v10  ;;  %v2165_v10 = vld [vmem:[%s4120_s5 + $0x8] sm:$0xff] }
 0x2de   :  { %v1990_v13 = vadd.f32 %v1989_v39, %v1988_v26  ;;  %v2027_v22 = vrot.slane %v2026_v3, 4  ;;  %v2164_v39 = vld [vmem:[%s4120_s5] sm:$0xff] }
 0x2e0   :  { %v1991_v17 = vrot.slane %v1990_v13, 2  ;;  %v2028_v35 = vadd.f32 %v2027_v22, %v2026_v3 }
 0x2e2   :  { %v1992_v60 = vadd.f32 %v1991_v17, %v1990_v13  ;;  %v2029_v55 = vrot.slane %v2028_v35, 2 }
 0x2e4   :  { %v1993_v48 = vrot.slane %v1992_v60, 1  ;;  %v2030_v57 = vadd.f32 %v2029_v55, %v2028_v35 }
 0x2e6   :  { %v1994_v23 = vadd.f32 %v1993_v48, %v1992_v60  ;;  %v2031_v7 = vrot.slane %v2030_v57, 1 }
 0x2e8   :  { %v3968_v19 = vmul.f32 0.010204081, %v1994_v23  ;;  %v2032_v45 = vadd.f32 %v2031_v7, %v2030_v57 }
 0x2ea   :  { %v2033_v24 = vmul.f32 0.010204081, %v2032_v45  ;;  %v2034_v36 = vmul.f32 %v3968_v19, %v3968_v19  ;;  %v2051_v16 = vsub.f32 %v1859_v49, %v3968_v19  ;;  %v2045_v62 = vsub.f32 %v3937_v20, %v3968_v19 }
 0x2eb   :  { %v2044_v21 = vsub.f32 %v3933_v42, %v3968_v19  ;;  %v2046_v33 = vsub.f32 %v3943_v30, %v3968_v19  ;;  %v2047_v47 = vsub.f32 %v3947_v53, %v3968_v19  ;;  %v2048_v29 = vsub.f32 %v3953_v18, %v3968_v19 }
 0x2ec   :  { %v2035_v6 = vsub.f32 %v2033_v24, %v2034_v36  ;;  %v2049_v58 = vsub.f32 %v3957_v5, %v3968_v19  ;;  %v2050_v51 = vsub.f32 %v3963_v32, %v3968_v19  ;;  %v2040_v20 = vsub.f32 %v3913_v1, %v3968_v19 }
 0x2ed   :  { %v2041_v30 = vsub.f32 %v3917_v14, %v3968_v19  ;;  %v2042_v53 = vsub.f32 %v3923_v25, %v3968_v19  ;;  %v2043_v4 = vsub.f32 %v3927_v63, %v3968_v19  ;;  %v2036_v37 = vsub.f32 %v3837_v15, %v3968_v19 }
 0x2ee   :  { %v2052_v42 = vadd.f32 1e-05, %v2035_v6  ;;  %v2037_v59 = vsub.f32 %v3840_v44, %v3968_v19  ;;  %v2038_v34 = vsub.f32 %v3901_v40, %v3968_v19 }
 0x2f0   :  { %2901 = vrsqrt.f32 %v2052_v42 }
 0x2fa   :  { %v3995_v18 = vpop.eup %2901 }
 0x2fb   :  { %v4009_v41 = vmul.f32 %v3995_v18, %v2051_v16  ;;  %v2063_v9 = vmul.f32 %v3995_v18, %v2045_v62  ;;  %v2062_v8 = vmul.f32 %v3995_v18, %v2044_v21  ;;  %v2064_v56 = vmul.f32 %v3995_v18, %v2046_v33  ;;  %v2166_v16 = vld [vmem:[%s4120_s5 + $0x10] sm:$0xff] }
 0x2fc   :  { %v2054_v15 = vmul.f32 %v3995_v18, %v2036_v37  ;;  %v2065_v44 = vmul.f32 %v3995_v18, %v2047_v47  ;;  %v2055_v40 = vmul.f32 %v3995_v18, %v2037_v59  ;;  %v2066_v43 = vmul.f32 %v3995_v18, %v2048_v29  ;;  %v2167_v47 = vld [vmem:[%s4120_s5 + $0x18] sm:$0xff] }
 0x2fd   :  { %v2086_v27 = vmul.f32 %v4000_v2, %v2063_v9  ;;  %v2085_v46 = vmul.f32 %v4000_v2, %v2062_v8  ;;  %v2087_v12 = vmul.f32 %v4000_v2, %v2064_v56  ;;  %v2056_v31 = vmul.f32 %v3995_v18, %v2038_v34 }
 0x2fe   :  { %v2077_v54 = vmul.f32 %v4000_v2, %v2054_v15  ;;  %v2088_v49 = vmul.f32 %v4000_v2, %v2065_v44  ;;  %v2078_v0 = vmul.f32 %v4000_v2, %v2055_v40  ;;  %v2089_v11 = vmul.f32 %v4000_v2, %v2066_v43 }
 0x2ff   :  { %v2109_v28 = vadd.f32 %v4017_v50, %v2086_v27  ;;  %v2108_v61 = vadd.f32 %v4017_v50, %v2085_v46  ;;  %v2110_v38 = vadd.f32 %v4017_v50, %v2087_v12  ;;  %v2079_v26 = vmul.f32 %v4000_v2, %v2056_v31  ;;  %v2168_v27 = vld [vmem:[%s4120_s5 + $0x20] sm:$0xff] }
 0x300   :  { %v2100_v3 = vadd.f32 %v4017_v50, %v2077_v54  ;;  %v2111_v13 = vadd.f32 %v4017_v50, %v2088_v49  ;;  %v2101_v22 = vadd.f32 %v4017_v50, %v2078_v0  ;;  %v2112_v17 = vadd.f32 %v4017_v50, %v2089_v11 }
 0x301   :  { %vm2125_vm5 = vcmp.ge.f32.partialorder %v2109_v28, 0.0  ;;  %v2141_v35 = vmul.f32 0.2, %v2109_v28  ;;  %vm2124_vm6 = vcmp.ge.f32.partialorder %v2108_v61, 0.0  ;;  %v2140_v60 = vmul.f32 0.2, %v2108_v61 }
 0x302   :  { %vm2126_vm7 = vcmp.ge.f32.partialorder %v2110_v38, 0.0  ;;  %v2142_v55 = vmul.f32 0.2, %v2110_v38  ;;  %vm2116_vm8 = vcmp.ge.f32.partialorder %v2100_v3, 0.0  ;;  %v2132_v48 = vmul.f32 0.2, %v2100_v3 }
 0x303   :  { %v2157_v57 = vsel %vm2125_vm5, %v2109_v28, %v2141_v35  ;;  %v2156_v23 = vsel %vm2124_vm6, %v2108_v61, %v2140_v60  ;;  %vm2127_vm9 = vcmp.ge.f32.partialorder %v2111_v13, 0.0  ;;  %v2143_v7 = vmul.f32 0.2, %v2111_v13 }
 0x304   :  { %v2181_v45 = vmul.f32 %v2165_v10, %v2157_v57  ;;  %v2180_v24 = vmul.f32 %v2164_v39, %v2156_v23  ;;  %v2158_v36 = vsel %vm2126_vm7, %v2110_v38, %v2142_v55  ;;  %v2148_v62 = vsel %vm2116_vm8, %v2100_v3, %v2132_v48  ;;  %v2170_v48 = vld [vmem:[%s4120_s5 + $0x30] sm:$0xff] }
 0x305   :  { %v2039_v21 = vsub.f32 %v3906_v52, %v3968_v19  ;;  %v2159_v33 = vsel %vm2127_vm9, %v2111_v13, %v2143_v7  ;;  %vm2117_vm10 = vcmp.ge.f32.partialorder %v2101_v22, 0.0  ;;  %v2133_v6 = vmul.f32 0.2, %v2101_v22 }
 0x306   :  { %2206 = vadd.xlane.f32.xlu1 %v2181_v45  ;;  %2204 = vadd.xlane.f32.xlu0 %v2180_v24  ;;  %v2144_v29 = vmul.f32 0.2, %v2112_v17  ;;  %v2102_v42 = vadd.f32 %v4017_v50, %v2079_v26  ;;  %v2067_v37 = vmul.f32 %v3995_v18, %v2049_v58  ;;  %v2068_v52 = vmul.f32 %v3995_v18, %v2050_v51  ;;  %v2169_v26 = vld [vmem:[%s4120_s5 + $0x28] sm:$0xff] }
 0x307   :  { %v2057_v59 = vmul.f32 %v3995_v18, %v2039_v21  ;;  %v2182_v34 = vmul.f32 %v2166_v16, %v2158_v36  ;;  %v2172_v9 = vmul.f32 %v2164_v39, %v2148_v62  ;;  %vm2128_vm11 = vcmp.ge.f32.partialorder %v2112_v17, 0.0 }
 0x308   :  { %v2058_v8 = vmul.f32 %v3995_v18, %v2040_v20  ;;  %v2183_v56 = vmul.f32 %v2167_v47, %v2159_v33  ;;  %v2149_v15 = vsel %vm2117_vm10, %v2101_v22, %v2133_v6  ;;  %v2134_v5 = vmul.f32 0.2, %v2102_v42 }
 0x309   :  { %vm2118_vm12 = vcmp.ge.f32.partialorder %v2102_v42, 0.0  ;;  %v2090_v58 = vmul.f32 %v4000_v2, %v2067_v37  ;;  %v2080_v32 = vmul.f32 %v4000_v2, %v2057_v59  ;;  %v2091_v51 = vmul.f32 %v4000_v2, %v2068_v52 }
 0x30a   :  { %2208 = vadd.xlane.f32.xlu1 %v2182_v34  ;;  %2188 = vadd.xlane.f32.xlu0 %v2172_v9  ;;  %v2160_v44 = vsel %vm2128_vm11, %v2112_v17, %v2144_v29  ;;  %v2081_v40 = vmul.f32 %v4000_v2, %v2058_v8  ;;  %v2092_v1 = vmul.f32 %v4000_v2, %v4009_v41  ;;  %v13_v29 = vstv %s4121_s6 }
 0x30b   :  { %v2059_v20 = vmul.f32 %v3995_v18, %v2041_v30  ;;  %v2173_v43 = vmul.f32 %v2165_v10, %v2149_v15  ;;  %v2113_v46 = vadd.f32 %v4017_v50, %v2090_v58  ;;  %v2103_v12 = vadd.f32 %v4017_v50, %v2080_v32  ;;  %14 = vst [vmem:[#allocation2] sm:$0x1] %v13_v29 }
 0x30c   :  { %v2114_v31 = vadd.f32 %v4017_v50, %v2091_v51  ;;  %v2150_v54 = vsel %vm2118_vm12, %v2102_v42, %v2134_v5  ;;  %v2104_v49 = vadd.f32 %v4017_v50, %v2081_v40  ;;  %v2184_v0 = vmul.f32 %v2168_v27, %v2160_v44 }
 0x30d   :  { %v2082_v41 = vmul.f32 %v4000_v2, %v2059_v20  ;;  %vm2129_vm13 = vcmp.ge.f32.partialorder %v2113_v46, 0.0  ;;  %v2145_v14 = vmul.f32 0.2, %v2113_v46  ;;  %vm2119_vm14 = vcmp.ge.f32.partialorder %v2103_v12, 0.0 }
 0x30e   :  { %2210 = vadd.xlane.f32.xlu1 %v2183_v56  ;;  %2190 = vadd.xlane.f32.xlu0 %v2173_v43  ;;  %v2135_v30 = vmul.f32 0.2, %v2103_v12  ;;  %v2174_v11 = vmul.f32 %v2166_v16, %v2150_v54  ;;  %vm2130_vm15 = vcmp.ge.f32.partialorder %v2114_v31, 0.0  ;;  %v2146_v28 = vmul.f32 0.2, %v2114_v31 }
 0x30f   :  { %v2115_v61 = vadd.f32 %v4017_v50, %v2092_v1  ;;  %v2161_v38 = vsel %vm2129_vm13, %v2113_v46, %v2145_v14  ;;  %v2136_v39 = vmul.f32 0.2, %v2104_v49  ;;  %v2105_v3 = vadd.f32 %v4017_v50, %v2082_v41 }
 0x310   :  { %v2151_v10 = vsel %vm2119_vm14, %v2103_v12, %v2135_v30  ;;  %vm2120_vm0 = vcmp.ge.f32.partialorder %v2104_v49, 0.0  ;;  %v2060_v13 = vmul.f32 %v3995_v18, %v2042_v53  ;;  %v2061_v22 = vmul.f32 %v3995_v18, %v2043_v4  ;;  %v2171_v18 = vld [vmem:[%s4120_s5 + $0x38] sm:$0xff] }
 0x311   :  { %v2185_v17 = vmul.f32 %v2169_v26, %v2161_v38  ;;  %v2175_v35 = vmul.f32 %v2167_v47, %v2151_v10  ;;  %v2162_v60 = vsel %vm2130_vm15, %v2114_v31, %v2146_v28  ;;  %v2147_v55 = vmul.f32 0.2, %v2115_v61 }
 0x312   :  { %2212 = vadd.xlane.f32.xlu1 %v2184_v0  ;;  %2192 = vadd.xlane.f32.xlu0 %v2174_v11  ;;  %v2152_v57 = vsel %vm2120_vm0, %v2104_v49, %v2136_v39  ;;  %v2137_v23 = vmul.f32 0.2, %v2105_v3  ;;  %v2083_v7 = vmul.f32 %v4000_v2, %v2060_v13  ;;  %v2084_v25 = vmul.f32 %v4000_v2, %v2061_v22 }
 0x313   :  { %vm2131_vm1 = vcmp.ge.f32.partialorder %v2115_v61, 0.0  ;;  %vm2121_vm2 = vcmp.ge.f32.partialorder %v2105_v3, 0.0  ;;  %v2186_v19 = vmul.f32 %v2170_v48, %v2162_v60  ;;  %v2176_v53 = vmul.f32 %v2168_v27, %v2152_v57 }
 0x314   :  { %v2106_v63 = vadd.f32 %v4017_v50, %v2083_v7  ;;  %v2163_v4 = vsel %vm2131_vm1, %v2115_v61, %v2147_v55  ;;  %v2153_v45 = vsel %vm2121_vm2, %v2105_v3, %v2137_v23  ;;  %v2107_v36 = vadd.f32 %v4017_v50, %v2084_v25  ;;  %v2415_v3 = vld [vmem:[#allocation2] ss:$0 sm:$0xff] }
 0x315   :  { %v2187_v2 = vmul.f32 %v2171_v18, %v2163_v4  ;;  %v2177_v16 = vmul.f32 %v2169_v26, %v2153_v45  ;;  %vm2270_vm5 = vcmask 1041409   ;;  %vm2273_vm6 = vcmask 1024  }
 0x316   :  { %2214 = vadd.xlane.f32.xlu1 %v2185_v17  ;;  %2194 = vadd.xlane.f32.xlu0 %v2175_v35  ;;  %v2138_v24 = vmul.f32 0.2, %v2106_v63  ;;  %vm2122_vm3 = vcmp.ge.f32.partialorder %v2106_v63, 0.0  ;;  %v2139_v21 = vmul.f32 0.2, %v2107_v36  ;;  %vm2123_vm4 = vcmp.ge.f32.partialorder %v2107_v36, 0.0 }
 0x318   :  { %v2154_v62 = vsel %vm2122_vm3, %v2106_v63, %v2138_v24  ;;  %v2155_v47 = vsel %vm2123_vm4, %v2107_v36, %v2139_v21 }
 0x319   :  { %v2178_v33 = vmul.f32 %v2170_v48, %v2154_v62  ;;  %v2179_v6 = vmul.f32 %v2171_v18, %v2155_v47 }
 0x31a   :  { %2216 = vadd.xlane.f32.xlu1 %v2186_v19  ;;  %2196 = vadd.xlane.f32.xlu0 %v2176_v53 }
 0x31e   :  { %2218 = vadd.xlane.f32.xlu1 %v2187_v2  ;;  %2198 = vadd.xlane.f32.xlu0 %v2177_v16 }
 0x322   :  { %2200 = vadd.xlane.f32.xlu0 %v2178_v33 }
 0x326   :  { %2202 = vadd.xlane.f32.xlu0 %v2179_v6 }
 0x393   :  { %v2207_v50 = vpop.xlane.xlu1 %2206  ;;  %v2205_v42 = vpop.xlane.xlu0 %2204 }
 0x394   :  { %v2233_v56 = vadd.f32 %v2207_v50, %v2205_v42 }
 0x397   :  { %v2209_v37 = vpop.xlane.xlu1 %2208  ;;  %v2189_v59 = vpop.xlane.xlu0 %2188 }
 0x398   :  { %v2234_v15 = vadd.f32 %v2233_v56, %v2209_v37 }
 0x39b   :  { %v2211_v52 = vpop.xlane.xlu1 %2210  ;;  %v2191_v34 = vpop.xlane.xlu0 %2190 }
 0x39c   :  { %v2235_v32 = vadd.f32 %v2234_v15, %v2211_v52  ;;  %v2220_v1 = vadd.f32 %v2191_v34, %v2189_v59 }
 0x39f   :  { %v2213_v9 = vpop.xlane.xlu1 %2212  ;;  %v2193_v8 = vpop.xlane.xlu0 %2192 }
 0x3a0   :  { %v2236_v51 = vadd.f32 %v2235_v32, %v2213_v9  ;;  %v2221_v43 = vadd.f32 %v2220_v1, %v2193_v8 }
 0x3a3   :  { %v2215_v5 = vpop.xlane.xlu1 %2214  ;;  %v2195_v58 = vpop.xlane.xlu0 %2194 }
 0x3a4   :  { %v2237_v20 = vadd.f32 %v2236_v51, %v2215_v5  ;;  %v2222_v31 = vadd.f32 %v2221_v43, %v2195_v58 }
 0x3a7   :  { %v2217_v44 = vpop.xlane.xlu1 %2216  ;;  %v2197_v40 = vpop.xlane.xlu0 %2196 }
 0x3a8   :  { %v2238_v27 = vadd.f32 %v2237_v20, %v2217_v44  ;;  %v2223_v49 = vadd.f32 %v2222_v31, %v2197_v40 }
 0x3ab   :  { %v2219_v46 = vpop.xlane.xlu1 %2218  ;;  %v2199_v12 = vpop.xlane.xlu0 %2198 }
 0x3ac   :  { %v2239_v54 = vadd.f32 %v2238_v27, %v2219_v46  ;;  %v2224_v0 = vadd.f32 %v2223_v49, %v2199_v12 }
 0x3ae   :  { %v2240_v41 = vrot.slane %v2239_v54, 4 }
 0x3af   :  { %v2201_v14 = vpop.xlane.xlu0 %2200 }
 0x3b0   :  { %v2241_v30 = vadd.f32 %v2240_v41, %v2239_v54  ;;  %v2225_v28 = vadd.f32 %v2224_v0, %v2201_v14 }
 0x3b2   :  { %v2242_v11 = vrot.slane %v2241_v30, 2 }
 0x3b3   :  { %v2203_v61 = vpop.xlane.xlu0 %2202 }
 0x3b4   :  { %v2243_v38 = vadd.f32 %v2242_v11, %v2241_v30  ;;  %v2226_v26 = vadd.f32 %v2225_v28, %v2203_v61 }
 0x3b6   :  { %v2244_v10 = vrot.slane %v2243_v38, 1  ;;  %v2227_v39 = vrot.slane %v2226_v26, 4 }
 0x3b8   :  { %v2245_v13 = vadd.f32 %v2244_v10, %v2243_v38  ;;  %v2228_v22 = vadd.f32 %v2227_v39, %v2226_v26 }
 0x3ba   :  { %v2254_v17 = vadd.f32 %v2415_v3, %v2245_v13  ;;  %v2229_v35 = vrot.slane %v2228_v22, 2 }
 0x3bc   :  { %v2417_v60 = vmul.f32 -1.442695, %v2254_v17  ;;  %v2230_v55 = vadd.f32 %v2229_v35, %v2228_v22 }
 0x3be   :  { %2903 = vpow2.f32 %v2417_v60  ;;  %v2231_v48 = vrot.slane %v2230_v55, 1 }
 0x3c0   :  { %v2232_v57 = vadd.f32 %v2231_v48, %v2230_v55 }
 0x3c2   :  { %v2253_v23 = vadd.f32 %v2415_v3, %v2232_v57 }
 0x3c4   :  { %v2416_v7 = vmul.f32 -1.442695, %v2253_v23 }
 0x3c6   :  { %2905 = vpow2.f32 %v2416_v7 }
 0x3c8   :  { %v2904_v25 = vpop.eup %2903 }
 0x3c9   :  { %v2262_v63 = vadd.f32 1.0, %v2904_v25 }
 0x3cb   :  { %2907 = vrcp.f32 %v2262_v63 }
 0x3d0   :  { %v2906_v19 = vpop.eup %2905 }
 0x3d1   :  { %v2261_v53 = vadd.f32 1.0, %v2906_v19 }
 0x3d3   :  { %2909 = vrcp.f32 %v2261_v53 }
 0x3d5   :  { %v2908_v4 = vpop.eup %2907 }
 0x3d6   :  { %v2269_v18 = vrot.slane %v2908_v4, 7 }
 0x3dd   :  { %v2910_v45 = vpop.eup %2909 }
 0x3de   :  { %v2271_v24 = vsel %vm2270_vm5, %v2269_v18, %v2910_v45 }
 0x3df   :  { %2274 = vst.msk [vmem:[%s4122_s8] sm:$0x3] %vm2273_vm6, %v2271_v24 }

</bundles_post_ra>
